<compile_context>
chip_gen: v6e
topology: v6e:2x2x1
jax: 0.10.0
libtpu: 0.0.40
codegen_flags: <defaults>
</compile_context>

<pallas_src>
import jax
import jax.numpy as jnp
import numpy as np
from jax.experimental import pallas as pl
from jax.experimental.pallas import tpu as pltpu


def _round_up(x, m):
    return ((x + m - 1) // m) * m


# ----------------------------------------------------------------------------
# Pallas kernel: hoisted input projection + GRU recurrence + SiLU + Linear.
# ----------------------------------------------------------------------------
def rum_kernel(x_ref,      # (T*N, F)   time-major flattened input
               wi_ref,     # (F, 3*HP)  packed [W_ir | W_iz | W_in] (padded)
               wh_ref,     # (HP, 3*HP) packed [W_hr | W_hz | W_hn] (padded)
               bi_ref,     # (1, 3*HP)  [b_ir+b_hr | b_iz+b_hz | b_in]
               bhn_ref,    # (1, HP)    b_hn
               wl_ref,     # (HP, OP)   output Linear weight (padded)
               bl_ref,     # (1, OP)    output Linear bias (padded)
               out_ref,    # (N, OP)
               gi_ref):    # scratch: (T*N, 3*HP)
    TN = x_ref.shape[0]
    N = out_ref.shape[0]
    HP = bhn_ref.shape[1]
    T = TN // N

    # --- Hoisted input-side projection: one wide MXU matmul for all steps ---
    gi_ref[...] = (
        jnp.dot(x_ref[...], wi_ref[...], preferred_element_type=jnp.float32)
        + bi_ref[...]
    )

    b_hn = bhn_ref[...]  # (1, HP), loaded once
    wh = wh_ref[...]     # (HP, 3*HP), loaded once

    # --- Step 0 peeled: h_prev == 0, so gh == 0 and its matmul is skipped ---
    gi0 = gi_ref[pl.ds(0, N), :]                                   # (N, 3*HP)
    rz0 = jax.nn.sigmoid(gi0[:, : 2 * HP])
    r0 = rz0[:, :HP]
    z0 = rz0[:, HP:]
    n0 = jnp.tanh(gi0[:, 2 * HP:] + r0 * b_hn)
    h0 = (1.0 - z0) * n0                                           # (N, HP)

    # --- Serial GRU recurrence: 1 matmul + elementwise per remaining step ---
    def step(t, h):
        gi = gi_ref[pl.ds(t * N, N), :]                            # (N, 3*HP)
        gh = jnp.dot(h, wh, preferred_element_type=jnp.float32)
        rz = jax.nn.sigmoid(gi[:, : 2 * HP] + gh[:, : 2 * HP])     # (N, 2*HP)
        r = rz[:, :HP]
        z = rz[:, HP:]
        n = jnp.tanh(gi[:, 2 * HP:] + r * (gh[:, 2 * HP:] + b_hn))
        return (1.0 - z) * n + z * h

    h = jax.lax.fori_loop(1, T, step, h0, unroll=True)

    # --- SiLU on final hidden state, then the output projection (lane-dense) ---
    s = h * jax.nn.sigmoid(h)
    out_ref[...] = (
        jnp.dot(s, wl_ref[...], preferred_element_type=jnp.float32)
        + bl_ref[...]
    ).astype(out_ref.dtype)


# ----------------------------------------------------------------------------
# Wrapper: parameter packing / padding (PyTorch [r, z, n] gate order) + call.
# ----------------------------------------------------------------------------
@jax.jit
def small_rum_forward(x, params):
    B, R, T, F = x.shape
    N = B * R
    H = params["w_hh"].shape[1]
    O = params["w_lin"].shape[0]

    NP = _round_up(N, 8)       # sublane-aligned row count
    HP = _round_up(H, 128)     # lane-dense hidden width
    OP = _round_up(O, 128)     # lane-dense output width

    # Time-major, flattened, row-padded input slab: (T*NP, F).
    x_nm = x.reshape(N, T, F).astype(jnp.float32)
    x_nm = jnp.pad(x_nm, ((0, NP - N), (0, 0), (0, 0)))
    x_tm = jnp.transpose(x_nm, (1, 0, 2)).reshape(T * NP, F)

    w_ih, w_hh = params["w_ih"], params["w_hh"]        # (3H, F), (3H, H)
    b_ih, b_hh = params["b_ih"], params["b_hh"]        # (3H,),   (3H,)

    # Packed, zero-padded gate weights: each gate occupies a 128-aligned block.
    wi = jnp.zeros((F, 3 * HP), jnp.float32)
    wh = jnp.zeros((HP, 3 * HP), jnp.float32)
    for g in range(3):
        wi = wi.at[:, g * HP: g * HP + H].set(w_ih[g * H:(g + 1) * H, :].T)
        wh = wh.at[:H, g * HP: g * HP + H].set(w_hh[g * H:(g + 1) * H, :].T)

    # Pre-summed biases (r, z get b_i + b_h; n keeps b_in here, b_hn separate).
    bi = jnp.zeros((1, 3 * HP), jnp.float32)
    bi = bi.at[0, 0 * HP: 0 * HP + H].set(b_ih[0:H] + b_hh[0:H])
    bi = bi.at[0, 1 * HP: 1 * HP + H].set(b_ih[H:2 * H] + b_hh[H:2 * H])
    bi = bi.at[0, 2 * HP: 2 * HP + H].set(b_ih[2 * H:3 * H])
    bhn = jnp.zeros((1, HP), jnp.float32).at[0, :H].set(b_hh[2 * H:3 * H])

    # Output Linear, padded to a lane-dense slab.
    wl = jnp.zeros((HP, OP), jnp.float32).at[:H, :O].set(params["w_lin"].T)
    bl = jnp.zeros((1, OP), jnp.float32).at[0, :O].set(params["b_lin"])

    flops = (2 * T * NP * F * 3 * HP              # hoisted input projection
             + 2 * (T - 1) * NP * HP * 3 * HP     # recurrent matmuls (t=0 peeled)
             + 2 * NP * HP * OP)                  # output Linear
    transcendentals = T * NP * 3 * HP + NP * HP
    bytes_accessed = 4 * (T * NP * F + F * 3 * HP + HP * 3 * HP
                          + 3 * HP + HP + HP * OP + OP + NP * OP)

    vmem = pl.BlockSpec(memory_space=pltpu.MemorySpace.VMEM)
    y = pl.pallas_call(
        rum_kernel,
        out_shape=jax.ShapeDtypeStruct((NP, OP), jnp.float32),
        in_specs=[vmem] * 7,
        out_specs=vmem,
        scratch_shapes=[pltpu.VMEM((T * NP, 3 * HP), jnp.float32)],
        compiler_params=pltpu.CompilerParams(vmem_limit_bytes=64 * 1024 * 1024),
        cost_estimate=pl.CostEstimate(flops=flops,
                                      transcendentals=transcendentals,
                                      bytes_accessed=bytes_accessed),
    )(x_tm, wi, wh, bi, bhn, wl, bl)

    return y[:N, :O].reshape(B, R, O)


# ----------------------------------------------------------------------------
# Pure-JAX reference (mirrors torch.nn.GRU + SiLU + Linear semantics).
# ----------------------------------------------------------------------------
def ref_forward(x, params):
    B, R, T, F = x.shape
    N = B * R
    H = params["w_hh"].shape[1]
    w_ih, w_hh = params["w_ih"], params["w_hh"]
    b_ih, b_hh = params["b_ih"], params["b_hh"]

    def cell(h, xt):
        gi = xt @ w_ih.T + b_ih
        gh = h @ w_hh.T + b_hh
        i_r, i_z, i_n = jnp.split(gi, 3, axis=-1)
        h_r, h_z, h_n = jnp.split(gh, 3, axis=-1)
        r = jax.nn.sigmoid(i_r + h_r)
        z = jax.nn.sigmoid(i_z + h_z)
        n = jnp.tanh(i_n + r * h_n)
        return (1.0 - z) * n + z * h, None

    xs = jnp.transpose(x.reshape(N, T, F), (1, 0, 2))
    h, _ = jax.lax.scan(cell, jnp.zeros((N, H), jnp.float32), xs)
    h = h.reshape(B, R, H)
    s = jax.nn.silu(h)
    return s @ params["w_lin"].T + params["b_lin"]


# ----------------------------------------------------------------------------
# Deterministic parameter init (PyTorch-style U(-1/sqrt(H), 1/sqrt(H))).
# ----------------------------------------------------------------------------
def init_params(key, in_features, out_features, hidden_features):
    k = 1.0 / np.sqrt(hidden_features)
    ks = jax.random.split(key, 6)
    u = lambda kk, shape: jax.random.uniform(kk, shape, jnp.float32, -k, k)
    return {
        "w_ih": u(ks[0], (3 * hidden_features, in_features)),
        "w_hh": u(ks[1], (3 * hidden_features, hidden_features)),
        "b_ih": u(ks[2], (3 * hidden_features,)),
        "b_hh": u(ks[3], (3 * hidden_features,)),
        "w_lin": u(ks[4], (out_features, hidden_features)),
        "b_lin": u(ks[5], (out_features,)),
    }


if __name__ == "__main__":
    B, R, T = 2, 4, 8
    in_features, hidden_features, out_features = 16, 32, 8

    key = jax.random.PRNGKey(0)
    kx, kp = jax.random.split(key)
    x = jax.random.normal(kx, (B, R, T, in_features), dtype=jnp.float32)
    params = init_params(kp, in_features, out_features, hidden_features)

    y = jax.block_until_ready(small_rum_forward(x, params))
    y_ref = jax.block_until_ready(ref_forward(x, params))
    np.testing.assert_allclose(np.asarray(y), np.asarray(y_ref),
                               rtol=1e-5, atol=1e-5)

    print("KERNEL_OK")
</pallas_src>

<mosaic_0001>
module attributes {stable_mosaic.version = 11 : i64} {
  func.func @rum_kernel(%arg0: memref<64x16xf32, #tpu.memory_space<vmem>>, %arg1: memref<16x384xf32, #tpu.memory_space<vmem>>, %arg2: memref<128x384xf32, #tpu.memory_space<vmem>>, %arg3: memref<1x384xf32, #tpu.memory_space<vmem>>, %arg4: memref<1x128xf32, #tpu.memory_space<vmem>>, %arg5: memref<128x128xf32, #tpu.memory_space<vmem>>, %arg6: memref<1x128xf32, #tpu.memory_space<vmem>>, %arg7: memref<8x128xf32, #tpu.memory_space<vmem>>, %arg8: memref<64x384xf32, #tpu.memory_space<vmem>>) attributes {dimension_semantics = [], scalar_prefetch = 0 : i64, scratch_operands = 1 : i64, tpu.core_type = #tpu.core_type<tc>} {
    %c0 = arith.constant 0 : index
    %c0_0 = arith.constant 0 : index
    %0 = vector.load %arg0[%c0, %c0_0] : memref<64x16xf32, #tpu.memory_space<vmem>>, vector<64x16xf32>
    %c0_1 = arith.constant 0 : index
    %c0_2 = arith.constant 0 : index
    %1 = vector.load %arg1[%c0_1, %c0_2] : memref<16x384xf32, #tpu.memory_space<vmem>>, vector<16x384xf32>
    %cst = arith.constant dense<0.000000e+00> : vector<64x384xf32>
    %2 = tpu.matmul %0, %1, %cst {dimension_numbers = #tpu.dot_dimension_numbers<[1], [0], [0], [1], [0, 0, 1, 1], [], []>} : vector<64x16xf32>, vector<16x384xf32>, vector<64x384xf32> -> vector<64x384xf32>
    %c0_3 = arith.constant 0 : index
    %c0_4 = arith.constant 0 : index
    %3 = vector.load %arg3[%c0_3, %c0_4] : memref<1x384xf32, #tpu.memory_space<vmem>>, vector<1x384xf32>
    %4 = vector.broadcast %3 : vector<1x384xf32> to vector<64x384xf32>
    %5 = arith.addf %2, %4 : vector<64x384xf32>
    %c0_5 = arith.constant 0 : index
    %c0_6 = arith.constant 0 : index
    %6 = vector.load %arg8[%c0_5, %c0_6] : memref<64x384xf32, #tpu.memory_space<vmem>>, vector<64x384xf32>
    tpu.vector_store %arg8[%c0_5, %c0_6], %5 {strides = array<i32>} : memref<64x384xf32, #tpu.memory_space<vmem>>, vector<64x384xf32>,
    %c0_7 = arith.constant 0 : index
    %c0_8 = arith.constant 0 : index
    %7 = vector.load %arg4[%c0_7, %c0_8] : memref<1x128xf32, #tpu.memory_space<vmem>>, vector<1x128xf32>
    %c0_9 = arith.constant 0 : index
    %c0_10 = arith.constant 0 : index
    %8 = vector.load %arg2[%c0_9, %c0_10] : memref<128x384xf32, #tpu.memory_space<vmem>>, vector<128x384xf32>
    %c0_11 = arith.constant 0 : index
    %c0_12 = arith.constant 0 : index
    %9 = vector.load %arg8[%c0_11, %c0_12] : memref<64x384xf32, #tpu.memory_space<vmem>>, vector<8x384xf32>
    %10 = vector.extract_strided_slice %9 {offsets = [0, 0], sizes = [8, 256], strides = [1, 1]} : vector<8x384xf32> to vector<8x256xf32>
    %11 = arith.negf %10 : vector<8x256xf32>
    %12 = math.exp %11 : vector<8x256xf32>
    %cst_13 = arith.constant 1.000000e+00 : f32
    %13 = vector.broadcast %cst_13 : f32 to vector<8x256xf32>
    %14 = arith.addf %13, %12 : vector<8x256xf32>
    %15 = arith.divf %13, %14 : vector<8x256xf32>
    %16 = vector.extract_strided_slice %15 {offsets = [0, 0], sizes = [8, 128], strides = [1, 1]} : vector<8x256xf32> to vector<8x128xf32>
    %17 = vector.extract_strided_slice %15 {offsets = [0, 128], sizes = [8, 128], strides = [1, 1]} : vector<8x256xf32> to vector<8x128xf32>
    %18 = vector.extract_strided_slice %9 {offsets = [0, 256], sizes = [8, 128], strides = [1, 1]} : vector<8x384xf32> to vector<8x128xf32>
    %19 = vector.broadcast %7 : vector<1x128xf32> to vector<8x128xf32>
    %20 = arith.mulf %16, %19 : vector<8x128xf32>
    %21 = arith.addf %18, %20 : vector<8x128xf32>
    %22 = math.tanh %21 : vector<8x128xf32>
    %cst_14 = arith.constant 1.000000e+00 : f32
    %23 = vector.broadcast %cst_14 : f32 to vector<8x128xf32>
    %24 = arith.subf %23, %17 : vector<8x128xf32>
    %25 = arith.mulf %24, %22 : vector<8x128xf32>
    %c1_i32 = arith.constant 1 : i32
    %c8_i32 = arith.constant 8 : i32
    %26 = arith.muli %c1_i32, %c8_i32 : i32
    %27 = arith.index_cast %26 : i32 to index
    %c0_15 = arith.constant 0 : index
    %28 = vector.load %arg8[%27, %c0_15] : memref<64x384xf32, #tpu.memory_space<vmem>>, vector<8x384xf32>
    %cst_16 = arith.constant dense<0.000000e+00> : vector<8x384xf32>
    %29 = tpu.matmul %25, %8, %cst_16 {dimension_numbers = #tpu.dot_dimension_numbers<[1], [0], [0], [1], [0, 0, 1, 1], [], []>} : vector<8x128xf32>, vector<128x384xf32>, vector<8x384xf32> -> vector<8x384xf32>
    %30 = vector.extract_strided_slice %28 {offsets = [0, 0], sizes = [8, 256], strides = [1, 1]} : vector<8x384xf32> to vector<8x256xf32>
    %31 = vector.extract_strided_slice %29 {offsets = [0, 0], sizes = [8, 256], strides = [1, 1]} : vector<8x384xf32> to vector<8x256xf32>
    %32 = arith.addf %30, %31 : vector<8x256xf32>
    %33 = arith.negf %32 : vector<8x256xf32>
    %34 = math.exp %33 : vector<8x256xf32>
    %cst_17 = arith.constant 1.000000e+00 : f32
    %35 = vector.broadcast %cst_17 : f32 to vector<8x256xf32>
    %36 = arith.addf %35, %34 : vector<8x256xf32>
    %37 = arith.divf %35, %36 : vector<8x256xf32>
    %38 = vector.extract_strided_slice %37 {offsets = [0, 0], sizes = [8, 128], strides = [1, 1]} : vector<8x256xf32> to vector<8x128xf32>
    %39 = vector.extract_strided_slice %37 {offsets = [0, 128], sizes = [8, 128], strides = [1, 1]} : vector<8x256xf32> to vector<8x128xf32>
    %40 = vector.extract_strided_slice %28 {offsets = [0, 256], sizes = [8, 128], strides = [1, 1]} : vector<8x384xf32> to vector<8x128xf32>
    %41 = vector.extract_strided_slice %29 {offsets = [0, 256], sizes = [8, 128], strides = [1, 1]} : vector<8x384xf32> to vector<8x128xf32>
    %42 = vector.broadcast %7 : vector<1x128xf32> to vector<8x128xf32>
    %43 = arith.addf %41, %42 : vector<8x128xf32>
    %44 = arith.mulf %38, %43 : vector<8x128xf32>
    %45 = arith.addf %40, %44 : vector<8x128xf32>
    %46 = math.tanh %45 : vector<8x128xf32>
    %cst_18 = arith.constant 1.000000e+00 : f32
    %47 = vector.broadcast %cst_18 : f32 to vector<8x128xf32>
    %48 = arith.subf %47, %39 : vector<8x128xf32>
    %49 = arith.mulf %48, %46 : vector<8x128xf32>
    %50 = arith.mulf %39, %25 : vector<8x128xf32>
    %51 = arith.addf %49, %50 : vector<8x128xf32>
    %c2_i32 = arith.constant 2 : i32
    %c8_i32_19 = arith.constant 8 : i32
    %52 = arith.muli %c2_i32, %c8_i32_19 : i32
    %53 = arith.index_cast %52 : i32 to index
    %c0_20 = arith.constant 0 : index
    %54 = vector.load %arg8[%53, %c0_20] : memref<64x384xf32, #tpu.memory_space<vmem>>, vector<8x384xf32>
    %cst_21 = arith.constant dense<0.000000e+00> : vector<8x384xf32>
    %55 = tpu.matmul %51, %8, %cst_21 {dimension_numbers = #tpu.dot_dimension_numbers<[1], [0], [0], [1], [0, 0, 1, 1], [], []>} : vector<8x128xf32>, vector<128x384xf32>, vector<8x384xf32> -> vector<8x384xf32>
    %56 = vector.extract_strided_slice %54 {offsets = [0, 0], sizes = [8, 256], strides = [1, 1]} : vector<8x384xf32> to vector<8x256xf32>
    %57 = vector.extract_strided_slice %55 {offsets = [0, 0], sizes = [8, 256], strides = [1, 1]} : vector<8x384xf32> to vector<8x256xf32>
    %58 = arith.addf %56, %57 : vector<8x256xf32>
    %59 = arith.negf %58 : vector<8x256xf32>
    %60 = math.exp %59 : vector<8x256xf32>
    %cst_22 = arith.constant 1.000000e+00 : f32
    %61 = vector.broadcast %cst_22 : f32 to vector<8x256xf32>
    %62 = arith.addf %61, %60 : vector<8x256xf32>
    %63 = arith.divf %61, %62 : vector<8x256xf32>
    %64 = vector.extract_strided_slice %63 {offsets = [0, 0], sizes = [8, 128], strides = [1, 1]} : vector<8x256xf32> to vector<8x128xf32>
    %65 = vector.extract_strided_slice %63 {offsets = [0, 128], sizes = [8, 128], strides = [1, 1]} : vector<8x256xf32> to vector<8x128xf32>
    %66 = vector.extract_strided_slice %54 {offsets = [0, 256], sizes = [8, 128], strides = [1, 1]} : vector<8x384xf32> to vector<8x128xf32>
    %67 = vector.extract_strided_slice %55 {offsets = [0, 256], sizes = [8, 128], strides = [1, 1]} : vector<8x384xf32> to vector<8x128xf32>
    %68 = vector.broadcast %7 : vector<1x128xf32> to vector<8x128xf32>
    %69 = arith.addf %67, %68 : vector<8x128xf32>
    %70 = arith.mulf %64, %69 : vector<8x128xf32>
    %71 = arith.addf %66, %70 : vector<8x128xf32>
    %72 = math.tanh %71 : vector<8x128xf32>
    %cst_23 = arith.constant 1.000000e+00 : f32
    %73 = vector.broadcast %cst_23 : f32 to vector<8x128xf32>
    %74 = arith.subf %73, %65 : vector<8x128xf32>
    %75 = arith.mulf %74, %72 : vector<8x128xf32>
    %76 = arith.mulf %65, %51 : vector<8x128xf32>
    %77 = arith.addf %75, %76 : vector<8x128xf32>
    %c3_i32 = arith.constant 3 : i32
    %c8_i32_24 = arith.constant 8 : i32
    %78 = arith.muli %c3_i32, %c8_i32_24 : i32
    %79 = arith.index_cast %78 : i32 to index
    %c0_25 = arith.constant 0 : index
    %80 = vector.load %arg8[%79, %c0_25] : memref<64x384xf32, #tpu.memory_space<vmem>>, vector<8x384xf32>
    %cst_26 = arith.constant dense<0.000000e+00> : vector<8x384xf32>
    %81 = tpu.matmul %77, %8, %cst_26 {dimension_numbers = #tpu.dot_dimension_numbers<[1], [0], [0], [1], [0, 0, 1, 1], [], []>} : vector<8x128xf32>, vector<128x384xf32>, vector<8x384xf32> -> vector<8x384xf32>
    %82 = vector.extract_strided_slice %80 {offsets = [0, 0], sizes = [8, 256], strides = [1, 1]} : vector<8x384xf32> to vector<8x256xf32>
    %83 = vector.extract_strided_slice %81 {offsets = [0, 0], sizes = [8, 256], strides = [1, 1]} : vector<8x384xf32> to vector<8x256xf32>
    %84 = arith.addf %82, %83 : vector<8x256xf32>
    %85 = arith.negf %84 : vector<8x256xf32>
    %86 = math.exp %85 : vector<8x256xf32>
    %cst_27 = arith.constant 1.000000e+00 : f32
    %87 = vector.broadcast %cst_27 : f32 to vector<8x256xf32>
    %88 = arith.addf %87, %86 : vector<8x256xf32>
    %89 = arith.divf %87, %88 : vector<8x256xf32>
    %90 = vector.extract_strided_slice %89 {offsets = [0, 0], sizes = [8, 128], strides = [1, 1]} : vector<8x256xf32> to vector<8x128xf32>
    %91 = vector.extract_strided_slice %89 {offsets = [0, 128], sizes = [8, 128], strides = [1, 1]} : vector<8x256xf32> to vector<8x128xf32>
    %92 = vector.extract_strided_slice %80 {offsets = [0, 256], sizes = [8, 128], strides = [1, 1]} : vector<8x384xf32> to vector<8x128xf32>
    %93 = vector.extract_strided_slice %81 {offsets = [0, 256], sizes = [8, 128], strides = [1, 1]} : vector<8x384xf32> to vector<8x128xf32>
    %94 = vector.broadcast %7 : vector<1x128xf32> to vector<8x128xf32>
    %95 = arith.addf %93, %94 : vector<8x128xf32>
    %96 = arith.mulf %90, %95 : vector<8x128xf32>
    %97 = arith.addf %92, %96 : vector<8x128xf32>
    %98 = math.tanh %97 : vector<8x128xf32>
    %cst_28 = arith.constant 1.000000e+00 : f32
    %99 = vector.broadcast %cst_28 : f32 to vector<8x128xf32>
    %100 = arith.subf %99, %91 : vector<8x128xf32>
    %101 = arith.mulf %100, %98 : vector<8x128xf32>
    %102 = arith.mulf %91, %77 : vector<8x128xf32>
    %103 = arith.addf %101, %102 : vector<8x128xf32>
    %c4_i32 = arith.constant 4 : i32
    %c8_i32_29 = arith.constant 8 : i32
    %104 = arith.muli %c4_i32, %c8_i32_29 : i32
    %105 = arith.index_cast %104 : i32 to index
    %c0_30 = arith.constant 0 : index
    %106 = vector.load %arg8[%105, %c0_30] : memref<64x384xf32, #tpu.memory_space<vmem>>, vector<8x384xf32>
    %cst_31 = arith.constant dense<0.000000e+00> : vector<8x384xf32>
    %107 = tpu.matmul %103, %8, %cst_31 {dimension_numbers = #tpu.dot_dimension_numbers<[1], [0], [0], [1], [0, 0, 1, 1], [], []>} : vector<8x128xf32>, vector<128x384xf32>, vector<8x384xf32> -> vector<8x384xf32>
    %108 = vector.extract_strided_slice %106 {offsets = [0, 0], sizes = [8, 256], strides = [1, 1]} : vector<8x384xf32> to vector<8x256xf32>
    %109 = vector.extract_strided_slice %107 {offsets = [0, 0], sizes = [8, 256], strides = [1, 1]} : vector<8x384xf32> to vector<8x256xf32>
    %110 = arith.addf %108, %109 : vector<8x256xf32>
    %111 = arith.negf %110 : vector<8x256xf32>
    %112 = math.exp %111 : vector<8x256xf32>
    %cst_32 = arith.constant 1.000000e+00 : f32
    %113 = vector.broadcast %cst_32 : f32 to vector<8x256xf32>
    %114 = arith.addf %113, %112 : vector<8x256xf32>
    %115 = arith.divf %113, %114 : vector<8x256xf32>
    %116 = vector.extract_strided_slice %115 {offsets = [0, 0], sizes = [8, 128], strides = [1, 1]} : vector<8x256xf32> to vector<8x128xf32>
    %117 = vector.extract_strided_slice %115 {offsets = [0, 128], sizes = [8, 128], strides = [1, 1]} : vector<8x256xf32> to vector<8x128xf32>
    %118 = vector.extract_strided_slice %106 {offsets = [0, 256], sizes = [8, 128], strides = [1, 1]} : vector<8x384xf32> to vector<8x128xf32>
    %119 = vector.extract_strided_slice %107 {offsets = [0, 256], sizes = [8, 128], strides = [1, 1]} : vector<8x384xf32> to vector<8x128xf32>
    %120 = vector.broadcast %7 : vector<1x128xf32> to vector<8x128xf32>
    %121 = arith.addf %119, %120 : vector<8x128xf32>
    %122 = arith.mulf %116, %121 : vector<8x128xf32>
    %123 = arith.addf %118, %122 : vector<8x128xf32>
    %124 = math.tanh %123 : vector<8x128xf32>
    %cst_33 = arith.constant 1.000000e+00 : f32
    %125 = vector.broadcast %cst_33 : f32 to vector<8x128xf32>
    %126 = arith.subf %125, %117 : vector<8x128xf32>
    %127 = arith.mulf %126, %124 : vector<8x128xf32>
    %128 = arith.mulf %117, %103 : vector<8x128xf32>
    %129 = arith.addf %127, %128 : vector<8x128xf32>
    %c5_i32 = arith.constant 5 : i32
    %c8_i32_34 = arith.constant 8 : i32
    %130 = arith.muli %c5_i32, %c8_i32_34 : i32
    %131 = arith.index_cast %130 : i32 to index
    %c0_35 = arith.constant 0 : index
    %132 = vector.load %arg8[%131, %c0_35] : memref<64x384xf32, #tpu.memory_space<vmem>>, vector<8x384xf32>
    %cst_36 = arith.constant dense<0.000000e+00> : vector<8x384xf32>
    %133 = tpu.matmul %129, %8, %cst_36 {dimension_numbers = #tpu.dot_dimension_numbers<[1], [0], [0], [1], [0, 0, 1, 1], [], []>} : vector<8x128xf32>, vector<128x384xf32>, vector<8x384xf32> -> vector<8x384xf32>
    %134 = vector.extract_strided_slice %132 {offsets = [0, 0], sizes = [8, 256], strides = [1, 1]} : vector<8x384xf32> to vector<8x256xf32>
    %135 = vector.extract_strided_slice %133 {offsets = [0, 0], sizes = [8, 256], strides = [1, 1]} : vector<8x384xf32> to vector<8x256xf32>
    %136 = arith.addf %134, %135 : vector<8x256xf32>
    %137 = arith.negf %136 : vector<8x256xf32>
    %138 = math.exp %137 : vector<8x256xf32>
    %cst_37 = arith.constant 1.000000e+00 : f32
    %139 = vector.broadcast %cst_37 : f32 to vector<8x256xf32>
    %140 = arith.addf %139, %138 : vector<8x256xf32>
    %141 = arith.divf %139, %140 : vector<8x256xf32>
    %142 = vector.extract_strided_slice %141 {offsets = [0, 0], sizes = [8, 128], strides = [1, 1]} : vector<8x256xf32> to vector<8x128xf32>
    %143 = vector.extract_strided_slice %141 {offsets = [0, 128], sizes = [8, 128], strides = [1, 1]} : vector<8x256xf32> to vector<8x128xf32>
    %144 = vector.extract_strided_slice %132 {offsets = [0, 256], sizes = [8, 128], strides = [1, 1]} : vector<8x384xf32> to vector<8x128xf32>
    %145 = vector.extract_strided_slice %133 {offsets = [0, 256], sizes = [8, 128], strides = [1, 1]} : vector<8x384xf32> to vector<8x128xf32>
    %146 = vector.broadcast %7 : vector<1x128xf32> to vector<8x128xf32>
    %147 = arith.addf %145, %146 : vector<8x128xf32>
    %148 = arith.mulf %142, %147 : vector<8x128xf32>
    %149 = arith.addf %144, %148 : vector<8x128xf32>
    %150 = math.tanh %149 : vector<8x128xf32>
    %cst_38 = arith.constant 1.000000e+00 : f32
    %151 = vector.broadcast %cst_38 : f32 to vector<8x128xf32>
    %152 = arith.subf %151, %143 : vector<8x128xf32>
    %153 = arith.mulf %152, %150 : vector<8x128xf32>
    %154 = arith.mulf %143, %129 : vector<8x128xf32>
    %155 = arith.addf %153, %154 : vector<8x128xf32>
    %c6_i32 = arith.constant 6 : i32
    %c8_i32_39 = arith.constant 8 : i32
    %156 = arith.muli %c6_i32, %c8_i32_39 : i32
    %157 = arith.index_cast %156 : i32 to index
    %c0_40 = arith.constant 0 : index
    %158 = vector.load %arg8[%157, %c0_40] : memref<64x384xf32, #tpu.memory_space<vmem>>, vector<8x384xf32>
    %cst_41 = arith.constant dense<0.000000e+00> : vector<8x384xf32>
    %159 = tpu.matmul %155, %8, %cst_41 {dimension_numbers = #tpu.dot_dimension_numbers<[1], [0], [0], [1], [0, 0, 1, 1], [], []>} : vector<8x128xf32>, vector<128x384xf32>, vector<8x384xf32> -> vector<8x384xf32>
    %160 = vector.extract_strided_slice %158 {offsets = [0, 0], sizes = [8, 256], strides = [1, 1]} : vector<8x384xf32> to vector<8x256xf32>
    %161 = vector.extract_strided_slice %159 {offsets = [0, 0], sizes = [8, 256], strides = [1, 1]} : vector<8x384xf32> to vector<8x256xf32>
    %162 = arith.addf %160, %161 : vector<8x256xf32>
    %163 = arith.negf %162 : vector<8x256xf32>
    %164 = math.exp %163 : vector<8x256xf32>
    %cst_42 = arith.constant 1.000000e+00 : f32
    %165 = vector.broadcast %cst_42 : f32 to vector<8x256xf32>
    %166 = arith.addf %165, %164 : vector<8x256xf32>
    %167 = arith.divf %165, %166 : vector<8x256xf32>
    %168 = vector.extract_strided_slice %167 {offsets = [0, 0], sizes = [8, 128], strides = [1, 1]} : vector<8x256xf32> to vector<8x128xf32>
    %169 = vector.extract_strided_slice %167 {offsets = [0, 128], sizes = [8, 128], strides = [1, 1]} : vector<8x256xf32> to vector<8x128xf32>
    %170 = vector.extract_strided_slice %158 {offsets = [0, 256], sizes = [8, 128], strides = [1, 1]} : vector<8x384xf32> to vector<8x128xf32>
    %171 = vector.extract_strided_slice %159 {offsets = [0, 256], sizes = [8, 128], strides = [1, 1]} : vector<8x384xf32> to vector<8x128xf32>
    %172 = vector.broadcast %7 : vector<1x128xf32> to vector<8x128xf32>
    %173 = arith.addf %171, %172 : vector<8x128xf32>
    %174 = arith.mulf %168, %173 : vector<8x128xf32>
    %175 = arith.addf %170, %174 : vector<8x128xf32>
    %176 = math.tanh %175 : vector<8x128xf32>
    %cst_43 = arith.constant 1.000000e+00 : f32
    %177 = vector.broadcast %cst_43 : f32 to vector<8x128xf32>
    %178 = arith.subf %177, %169 : vector<8x128xf32>
    %179 = arith.mulf %178, %176 : vector<8x128xf32>
    %180 = arith.mulf %169, %155 : vector<8x128xf32>
    %181 = arith.addf %179, %180 : vector<8x128xf32>
    %c7_i32 = arith.constant 7 : i32
    %c8_i32_44 = arith.constant 8 : i32
    %182 = arith.muli %c7_i32, %c8_i32_44 : i32
    %183 = arith.index_cast %182 : i32 to index
    %c0_45 = arith.constant 0 : index
    %184 = vector.load %arg8[%183, %c0_45] : memref<64x384xf32, #tpu.memory_space<vmem>>, vector<8x384xf32>
    %cst_46 = arith.constant dense<0.000000e+00> : vector<8x384xf32>
    %185 = tpu.matmul %181, %8, %cst_46 {dimension_numbers = #tpu.dot_dimension_numbers<[1], [0], [0], [1], [0, 0, 1, 1], [], []>} : vector<8x128xf32>, vector<128x384xf32>, vector<8x384xf32> -> vector<8x384xf32>
    %186 = vector.extract_strided_slice %184 {offsets = [0, 0], sizes = [8, 256], strides = [1, 1]} : vector<8x384xf32> to vector<8x256xf32>
    %187 = vector.extract_strided_slice %185 {offsets = [0, 0], sizes = [8, 256], strides = [1, 1]} : vector<8x384xf32> to vector<8x256xf32>
    %188 = arith.addf %186, %187 : vector<8x256xf32>
    %189 = arith.negf %188 : vector<8x256xf32>
    %190 = math.exp %189 : vector<8x256xf32>
    %cst_47 = arith.constant 1.000000e+00 : f32
    %191 = vector.broadcast %cst_47 : f32 to vector<8x256xf32>
    %192 = arith.addf %191, %190 : vector<8x256xf32>
    %193 = arith.divf %191, %192 : vector<8x256xf32>
    %194 = vector.extract_strided_slice %193 {offsets = [0, 0], sizes = [8, 128], strides = [1, 1]} : vector<8x256xf32> to vector<8x128xf32>
    %195 = vector.extract_strided_slice %193 {offsets = [0, 128], sizes = [8, 128], strides = [1, 1]} : vector<8x256xf32> to vector<8x128xf32>
    %196 = vector.extract_strided_slice %184 {offsets = [0, 256], sizes = [8, 128], strides = [1, 1]} : vector<8x384xf32> to vector<8x128xf32>
    %197 = vector.extract_strided_slice %185 {offsets = [0, 256], sizes = [8, 128], strides = [1, 1]} : vector<8x384xf32> to vector<8x128xf32>
    %198 = vector.broadcast %7 : vector<1x128xf32> to vector<8x128xf32>
    %199 = arith.addf %197, %198 : vector<8x128xf32>
    %200 = arith.mulf %194, %199 : vector<8x128xf32>
    %201 = arith.addf %196, %200 : vector<8x128xf32>
    %202 = math.tanh %201 : vector<8x128xf32>
    %cst_48 = arith.constant 1.000000e+00 : f32
    %203 = vector.broadcast %cst_48 : f32 to vector<8x128xf32>
    %204 = arith.subf %203, %195 : vector<8x128xf32>
    %205 = arith.mulf %204, %202 : vector<8x128xf32>
    %206 = arith.mulf %195, %181 : vector<8x128xf32>
    %207 = arith.addf %205, %206 : vector<8x128xf32>
    %c7_i32_49 = arith.constant 7 : i32
    %208 = arith.negf %207 : vector<8x128xf32>
    %209 = math.exp %208 : vector<8x128xf32>
    %cst_50 = arith.constant 1.000000e+00 : f32
    %210 = vector.broadcast %cst_50 : f32 to vector<8x128xf32>
    %211 = arith.addf %210, %209 : vector<8x128xf32>
    %212 = arith.divf %210, %211 : vector<8x128xf32>
    %213 = arith.mulf %207, %212 : vector<8x128xf32>
    %c0_51 = arith.constant 0 : index
    %c0_52 = arith.constant 0 : index
    %214 = vector.load %arg5[%c0_51, %c0_52] : memref<128x128xf32, #tpu.memory_space<vmem>>, vector<128x128xf32>
    %cst_53 = arith.constant dense<0.000000e+00> : vector<8x128xf32>
    %215 = tpu.matmul %213, %214, %cst_53 {dimension_numbers = #tpu.dot_dimension_numbers<[1], [0], [0], [1], [0, 0, 1, 1], [], []>} : vector<8x128xf32>, vector<128x128xf32>, vector<8x128xf32> -> vector<8x128xf32>
    %c0_54 = arith.constant 0 : index
    %c0_55 = arith.constant 0 : index
    %216 = vector.load %arg6[%c0_54, %c0_55] : memref<1x128xf32, #tpu.memory_space<vmem>>, vector<1x128xf32>
    %217 = vector.broadcast %216 : vector<1x128xf32> to vector<8x128xf32>
    %218 = arith.addf %215, %217 : vector<8x128xf32>
    %c0_56 = arith.constant 0 : index
    %c0_57 = arith.constant 0 : index
    %219 = vector.load %arg7[%c0_56, %c0_57] : memref<8x128xf32, #tpu.memory_space<vmem>>, vector<8x128xf32>
    tpu.vector_store %arg7[%c0_56, %c0_57], %218 {strides = array<i32>} : memref<8x128xf32, #tpu.memory_space<vmem>>, vector<8x128xf32>,
    return
  }
}

</mosaic_0001>

<bundles_post_ra>
// kernel: small_rum_forward.1
= control target key start
LH: loop header
LB: loop body
LE: loop exit
PB: predicated region body
PF: predicated region fallthrough
CT: control target
= control target key end

     0   :  { %v3593_v4 = vmov 0.0   ;;  %vm58_vm0 = vcmask 130048   ;;  %s3585_s0 = inlined_call_operand.vmem [shape: f32[64,16], index: 0, kind: input, shape index: {}]   ;;  %s3586_s1 = inlined_call_operand.vmem [shape: f32[16,384], index: 1, kind: input, shape index: {}]   ;;  %s3587_s2 = inlined_call_operand.vmem [shape: f32[128,384], index: 2, kind: input, shape index: {}]   ;;  %s3588_s3 = inlined_call_operand.vmem [shape: f32[1,384], index: 3, kind: input, shape index: {}]   ;;  %s3589_s4 = inlined_call_operand.vmem [shape: f32[1,128], index: 4, kind: input, shape index: {}]   ;;  %s3590_s5 = inlined_call_operand.vmem [shape: f32[128,128], index: 5, kind: input, shape index: {}]   ;;  %s3591_s6 = inlined_call_operand.vmem [shape: f32[1,128], index: 6, kind: input, shape index: {}]   ;;  %s3592_s7 = inlined_call_operand.hbm [shape: f32[8,128], index: 7, kind: output, shape index: {}]  }
   0x1   :  { %v39_v0 = vld [vmem:[%s3586_s1 + $0x20] sm:$0xff]  ;;  %v38_v1 = vld [vmem:[%s3586_s1 + $0x18] sm:$0xff]  ;;  %v36_v2 = vld [vmem:[%s3586_s1 + $0x8] sm:$0xff]  ;;  %147 = vmatprep.mubr.f32.mxu0 %v3593_v4 }
   0x2   :  { %111 = vmatprep.subr.mxu0 %v39_v0  ;;  %v35_v3 = vld [vmem:[%s3586_s1] sm:$0xff]  ;;  %v40_v5 = vld [vmem:[%s3586_s1 + $0x28] sm:$0xff]  ;;  %v37_v7 = vld [vmem:[%s3586_s1 + $0x10] sm:$0xff] }
   0x3   :  { %112 = vmatpush1.msra.mxu0 %v38_v1  ;;  %v27_v6 = vld [vmem:[%s3585_s0] sm:$0xff]  ;;  %1858 = vmatprep.subr.mxu1 %v40_v5 }
   0x4   :  { %113 = vmatprep.subr.mxu0 %v36_v2  ;;  %1859 = vmatpush3.msra.mxu1 %v40_v5 }
   0x5   :  { %12 = vsyncpa [#allocation4], 0  ;;  %114 = vmatpush1.msra.mxu0 %v35_v3  ;;  %1860 = vmatprep.subr.mxu1 %v37_v7  ;;  %v28_v8 = vld [vmem:[%s3585_s0 + $0x8] sm:$0xff]  ;;  %v2390_v9 = vld [vmem:[%s3587_s2 + $0x170] sm:$0xff]  ;;  %vm2313_vm1 = vmmov 0   ;;  %v43_v63 = vlaneseq  ;;  %s2314_s28 = smov [#allocation3]  }
   0x6   :  { %1677 = vmatmul.mubr.msk.f32.vlgmr.msra.gmra.mxu0 %vm58_vm0, %v27_v6  ;;  %1861 = vmatpush3.msra.mxu1 %v37_v7  ;;  %3619 = vst [vmem:[#allocation6_spill] sm:$0xff] %v2390_v9  ;;  %v2396_v10 = vld [vmem:[%s3587_s2 + $0x168] sm:$0xff]  ;;  %v2401_v11 = vld [vmem:[%s3587_s2 + $0x178] sm:$0xff]  ;;  %v2414_v13 = vld [vmem:[%s3587_s2 + $0x150] sm:$0xff] }
   0x7   :  { %1862 = vmatprep.mubr.msk.f32.mxu1 %vm58_vm0, %v27_v6  ;;  %1874 = vmatprep.subr.mxu1 %v3593_v4  ;;  %v2407_v12 = vld [vmem:[%s3587_s2 + $0x158] sm:$0xff]  ;;  %v2420_v14 = vld [vmem:[%s3587_s2 + $0x160] sm:$0xff]  ;;  %v2439_v17 = vld [vmem:[%s3587_s2 + $0x148] sm:$0xff]  ;;  %v44_v0 = vshrl.u32 %v43_v63, 7 }
   0x8   :  { %1863 = vmatmul.mubr.msk.f32.vlgmr.msra.gmra.mxu1 %vm58_vm0, %v28_v8  ;;  %153 = vmatprep.mubr.f32.mxu0 %v3593_v4  ;;  %v2426_v15 = vld [vmem:[%s3587_s2 + $0x140] sm:$0xff]  ;;  %v2433_v16 = vld [vmem:[%s3587_s2 + $0x138] sm:$0xff]  ;;  %v2445_v18 = vld [vmem:[%s3587_s2 + $0x128] sm:$0xff] }
   0x9   :  { %403 = vmatprep.subr.mxu0 %v2390_v9  ;;  %1875 = vmatpush3.msra.mxu1 %v2401_v11  ;;  %v29_v19 = vld [vmem:[%s3585_s0 + $0x10] sm:$0xff]  ;;  %v2456_v20 = vld [vmem:[%s3587_s2 + $0x120] sm:$0xff]  ;;  %v2475_v23 = vld [vmem:[%s3587_s2 + $0x108] sm:$0xff]  ;;  %v45_v1 = vsub.s32 0, %v44_v0  ;;  %v49_v5 = vsub.s32 1, %v44_v0  ;;  %v53_v63 = vsub.s32 2, %v44_v0 }
   0xa   :  { %1678 = vmatmul.mubr.msk.f32.gmra.mxu0 %vm58_vm0, %v28_v8  ;;  %1876 = vmatprep.subr.mxu1 %v3593_v4  ;;  %v2461_v21 = vld [vmem:[%s3587_s2 + $0x130] sm:$0xff]  ;;  %v2480_v24 = vld [vmem:[%s3587_s2 + $0x118] sm:$0xff]  ;;  %v2502_v28 = vld [vmem:[%s3587_s2 + $0x100] sm:$0xff] }
   0xb   :  { %159 = vmatprep.mubr.f32.mxu0 %v3593_v4  ;;  %404 = vmatpush1.msra.mxu0 %v2396_v10  ;;  %v2468_v22 = vld [vmem:[%s3587_s2 + $0x110] sm:$0xff]  ;;  %v2487_v25 = vld [vmem:[%s3587_s2 + $0xf8] sm:$0xff]  ;;  %v2509_v29 = vld [vmem:[%s3587_s2 + $0xe0] sm:$0xff] }
   0xc   :  { %405 = vmatprep.subr.mxu0 %v2407_v12  ;;  %1877 = vmatpush3.msra.mxu1 %v2420_v14  ;;  %v30_v26 = vld [vmem:[%s3585_s0 + $0x18] sm:$0xff]  ;;  %v2497_v27 = vld [vmem:[%s3587_s2 + $0xf0] sm:$0xff]  ;;  %v2523_v31 = vld [vmem:[%s3587_s2 + $0xc8] sm:$0xff] }
   0xd   :  { %406 = vmatpush1.msra.mxu0 %v2414_v13  ;;  %1878 = vmatprep.subr.mxu1 %v3593_v4  ;;  %v2516_v30 = vld [vmem:[%s3587_s2 + $0xd8] sm:$0xff]  ;;  %v2528_v32 = vld [vmem:[%s3587_s2 + $0xe8] sm:$0xff]  ;;  %v31_v33 = vld [vmem:[%s3585_s0 + $0x20] sm:$0xff] }
   0xe   :  { %407 = vmatprep.subr.mxu0 %v2426_v15  ;;  %1879 = vmatpush3.msra.mxu1 %v2439_v17  ;;  %v2538_v34 = vld [vmem:[%s3587_s2 + $0xc0] sm:$0xff]  ;;  %v2545_v35 = vld [vmem:[%s3587_s2 + $0xb0] sm:$0xff]  ;;  %v2557_v37 = vld [vmem:[%s3587_s2 + $0xa8] sm:$0xff] }
   0xf   :  { %408 = vmatpush1.msra.mxu0 %v2433_v16  ;;  %1880 = vmatprep.subr.mxu1 %v3593_v4  ;;  %v2550_v36 = vld [vmem:[%s3587_s2 + $0xd0] sm:$0xff]  ;;  %v2564_v38 = vld [vmem:[%s3587_s2 + $0x98] sm:$0xff]  ;;  %v32_v40 = vld [vmem:[%s3585_s0 + $0x28] sm:$0xff] }
  0x10   :  { %409 = vmatprep.subr.mxu0 %v2445_v18  ;;  %1679 = vmatmul.mubr.msk.f32.gmra.mxu0 %vm58_vm0, %v29_v19  ;;  %v2571_v39 = vld [vmem:[%s3587_s2 + $0xb8] sm:$0xff]  ;;  %v2581_v41 = vld [vmem:[%s3587_s2 + $0x90] sm:$0xff]  ;;  %v2588_v42 = vld [vmem:[%s3587_s2 + $0x80] sm:$0xff] }
  0x11   :  { %410 = vmatpush1.msra.mxu0 %v2456_v20  ;;  %1881 = vmatpush3.msra.mxu1 %v2461_v21  ;;  %v2595_v43 = vld [vmem:[%s3587_s2 + $0xa0] sm:$0xff]  ;;  %v2600_v44 = vld [vmem:[%s3587_s2 + $0x78] sm:$0xff]  ;;  %v2609_v45 = vld [vmem:[%s3587_s2 + $0x68] sm:$0xff] }
  0x12   :  { %411 = vmatprep.subr.mxu0 %v2468_v22  ;;  %1882 = vmatprep.subr.mxu1 %v3593_v4  ;;  %v2616_v46 = vld [vmem:[%s3587_s2 + $0x88] sm:$0xff]  ;;  %v33_v47 = vld [vmem:[%s3585_s0 + $0x30] sm:$0xff]  ;;  %v2626_v48 = vld [vmem:[%s3587_s2 + $0x60] sm:$0xff] }
  0x13   :  { %412 = vmatpush1.msra.mxu0 %v2475_v23  ;;  %165 = vmatprep.mubr.f32.mxu0 %v3593_v4  ;;  %v2633_v49 = vld [vmem:[%s3587_s2 + $0x50] sm:$0xff]  ;;  %v2645_v51 = vld [vmem:[%s3587_s2 + $0x48] sm:$0xff]  ;;  %v2654_v52 = vld [vmem:[%s3587_s2 + $0x38] sm:$0xff] }
  0x14   :  { %413 = vmatprep.subr.mxu0 %v2487_v25  ;;  %1883 = vmatpush3.msra.mxu1 %v2480_v24  ;;  %v2640_v50 = vld [vmem:[%s3587_s2 + $0x70] sm:$0xff]  ;;  %v2661_v53 = vld [vmem:[%s3587_s2 + $0x58] sm:$0xff]  ;;  %v2678_v56 = vld [vmem:[%s3587_s2 + $0x20] sm:$0xff] }
  0x15   :  { %1680 = vmatmul.mubr.msk.f32.gmra.mxu0 %vm58_vm0, %v30_v26  ;;  %1884 = vmatprep.subr.mxu1 %v3593_v4  ;;  %v34_v54 = vld [vmem:[%s3585_s0 + $0x38] sm:$0xff]  ;;  %v2671_v55 = vld [vmem:[%s3587_s2 + $0x30] sm:$0xff]  ;;  %3620 = vst [vmem:[#allocation7_spill] sm:$0xff] %v2678_v56  ;;  %v2685_v57 = vld [vmem:[%s3587_s2 + $0x40] sm:$0xff] }
  0x16   :  { %414 = vmatpush1.msra.mxu0 %v2497_v27  ;;  %1885 = vmatpush3.msra.mxu1 %v2502_v28  ;;  %3621 = vst [vmem:[#allocation8_spill] sm:$0xff] %v2685_v57  ;;  %v2690_v58 = vld [vmem:[%s3587_s2 + $0x18] sm:$0xff]  ;;  %v2699_v59 = vld [vmem:[%s3587_s2 + $0x8] sm:$0xff]  ;;  %v2711_v61 = vld [vmem:[%s3587_s2] sm:$0xff] }
  0x17   :  { %415 = vmatprep.subr.mxu0 %v2509_v29  ;;  %1886 = vmatprep.subr.mxu1 %v3593_v4  ;;  %3622 = vst [vmem:[#allocation9_spill] sm:$0xff] %v2690_v58  ;;  %3623 = vst [vmem:[#allocation10_spill] sm:$0xff] %v2699_v59  ;;  %v2704_v60 = vld [vmem:[%s3587_s2 + $0x28] sm:$0xff]  ;;  %v2718_v62 = vld [vmem:[%s3587_s2 + $0x10] sm:$0xff] }
  0x18   :  { %416 = vmatpush1.msra.mxu0 %v2516_v30  ;;  %171 = vmatprep.mubr.f32.mxu0 %v3593_v4  ;;  %3624 = vst [vmem:[#allocation11_spill] sm:$0xff] %v2704_v60  ;;  %3625 = vst [vmem:[#allocation12_spill] sm:$0xff] %v2711_v61  ;;  %v41_v2 = vld [vmem:[%s3588_s3] sm:$0x7]  ;;  %s1669_s3 = sshll.u32 %s2314_s28, 4  ;;  %s1670_s3 = int_to_ptr.vmem [resolvable:$true] %s1669_s3 }
  0x19   :  { %417 = vmatprep.subr.mxu0 %v2523_v31  ;;  %1887 = vmatpush3.msra.mxu1 %v2528_v32  ;;  %3626 = vst [vmem:[#allocation13_spill] sm:$0xff] %v2718_v62  ;;  %v2733_v3 = vrot.slane %v41_v2, %v45_v1  ;;  %s2290_s29 = scalar_lea.vmem %s1670_s3, 128  ;;  %p2295_p1 = scmp.lt.s32.totalorder %s1670_s3, %s1670_s3 }
  0x1a   :  { %1681 = vmatmul.mubr.msk.f32.gmra.mxu0 %vm58_vm0, %v31_v33  ;;  %1888 = vmatprep.subr.mxu1 %v3593_v4  ;;  %p2291_p0 = scmp.ne.s32.totalorder %s1670_s3, %s2290_s29  ;;  %p2296_p2 = scmp.lt.s32.totalorder %s2290_s29, %s2290_s29 }
  0x1b   :  { %418 = vmatpush1.msra.mxu0 %v2538_v34  ;;  %1889 = vmatpush3.msra.mxu1 %v2550_v36  ;;  %3627 = vst [vmem:[#allocation14_spill] sm:$0xff] %v2733_v3 }
  0x1c   :  { %419 = vmatprep.subr.mxu0 %v2545_v35  ;;  %1890 = vmatprep.subr.mxu1 %v3593_v4  ;;  %p2297_p3 = por %p2296_p2, %p2295_p1 }
  0x1d   :  { %420 = vmatpush1.msra.mxu0 %v2557_v37  ;;  %177 = vmatprep.mubr.f32.mxu0 %v3593_v4 }
  0x1e   :  { %421 = vmatprep.subr.mxu0 %v2564_v38  ;;  %1891 = vmatpush3.msra.mxu1 %v2571_v39  ;;  %p2298_p4 = pnand %p2297_p3, %p2291_p0 }
  0x1f   :  { %1682 = vmatmul.mubr.msk.f32.gmra.mxu0 %vm58_vm0, %v32_v40  ;;  %1892 = vmatprep.subr.mxu1 %v3593_v4 }
  0x20   :  { %422 = vmatpush1.msra.mxu0 %v2581_v41  ;;  %1865 = vmatprep.mubr.msk.f32.mxu1 %vm58_vm0, %v29_v19  ;;  %v2736_v19 = vrot.slane %v41_v2, %v49_v5  ;;  %v2746_v5 = vld [vmem:[%s3589_s4] ss:$0 sm:$0xff] }
  0x21   :  { %423 = vmatprep.subr.mxu0 %v2588_v42  ;;  %1893 = vmatpush3.msra.mxu1 %v2595_v43 }
  0x22   :  { %424 = vmatpush1.msra.mxu0 %v2600_v44  ;;  %1866 = vmatmul.mubr.msk.f32.gmra.mxu1 %vm58_vm0, %v30_v26 }
  0x23   :  { %1894 = vmatprep.subr.mxu1 %v3593_v4  ;;  %183 = vmatprep.mubr.f32.mxu0 %v3593_v4 }
  0x24   :  { %425 = vmatprep.subr.mxu0 %v2609_v45  ;;  %1895 = vmatpush3.msra.mxu1 %v2616_v46 }
  0x25   :  { %1683 = vmatmul.mubr.msk.f32.gmra.mxu0 %vm58_vm0, %v33_v47  ;;  %1896 = vmatprep.subr.mxu1 %v3593_v4 }
  0x26   :  { %426 = vmatpush1.msra.mxu0 %v2626_v48  ;;  %1868 = vmatprep.mubr.msk.f32.mxu1 %vm58_vm0, %v31_v33 }
  0x27   :  { %427 = vmatprep.subr.mxu0 %v2633_v49  ;;  %1897 = vmatpush3.msra.mxu1 %v2640_v50 }
  0x28   :  { %428 = vmatpush1.msra.mxu0 %v2645_v51  ;;  %1869 = vmatmul.mubr.msk.f32.gmra.mxu1 %vm58_vm0, %v32_v40 }
  0x29   :  { %1898 = vmatprep.subr.mxu1 %v3593_v4  ;;  %189 = vmatprep.mubr.f32.mxu0 %v3593_v4 }
  0x2a   :  { %429 = vmatprep.subr.mxu0 %v2654_v52  ;;  %1899 = vmatpush3.msra.mxu1 %v2661_v53 }
  0x2b   :  { %1684 = vmatmul.mubr.msk.f32.gmra.mxu0 %vm58_vm0, %v34_v54  ;;  %1900 = vmatprep.subr.mxu1 %v3593_v4 }
  0x2c   :  { %430 = vmatpush1.msra.mxu0 %v2671_v55  ;;  %1871 = vmatprep.mubr.msk.f32.mxu1 %vm58_vm0, %v33_v47 }
  0x2d   :  { %431 = vmatprep.subr.mxu0 %v2678_v56  ;;  %1901 = vmatpush3.msra.mxu1 %v2685_v57 }
  0x2e   :  { %432 = vmatpush1.msra.mxu0 %v2690_v58  ;;  %1872 = vmatmul.mubr.msk.f32.gmra.mxu1 %vm58_vm0, %v34_v54 }
  0x2f   :  { %1902 = vmatprep.subr.mxu1 %v3593_v4  ;;  %433 = vmatprep.subr.mxu0 %v2699_v59 }
  0x30   :  { %1903 = vmatpush3.msra.mxu1 %v2704_v60  ;;  %434 = vmatpush1.msra.mxu0 %v2711_v61 }
  0x31   :  { %1904 = vmatprep.subr.mxu1 %v3593_v4  ;;  %467 = vmatprep.mubr.f32.mxu0 %v3593_v4 }
  0x32   :  { %1905 = vmatpush3.msra.mxu1 %v2718_v62  ;;  %1906 = vmatprep.mubr.msk.f32.mxu1 %vm2313_vm1, %v3593_v4  ;;  %v2741_v62 = vrot.slane %v41_v2, %v53_v63  ;;  %v3629_v2 = vld [vmem:[#allocation13_spill] sm:$0xff] }
  0x33   :  { %569 = vmatprep.subr.mxu0 %v2390_v9  ;;  %1909 = vmatprep.subr.mxu1 %v3593_v4 }
  0xc6   :  { %v149_v6 = vpop.f32.mrf.mxu0 }
  0xc7   :  { %v150_v7 = vadd.f32 %v149_v6, %v2733_v3 }
  0xc8   :  { %v151_v26 = vpop.f32.mrf.mxu0  ;;  %v2739_v1 = vpop.f32.mrf.mxu1 }
  0xc9   :  { %v1693_v8 = vmul.f32 -1.442695, %v150_v7  ;;  %v152_v33 = vadd.f32 %v151_v26, %v2736_v19 }
  0xca   :  { %v262_v6 = vpop.f32.mrf.mxu1  ;;  %v155_v63 = vpop.f32.mrf.mxu0 }
  0xcb   :  { %2157 = vpow2.f32 %v1693_v8  ;;  %v1694_v40 = vmul.f32 -1.442695, %v152_v33  ;;  %v263_v8 = vadd.f32 %v262_v6, %v2741_v62 }
  0xcc   :  { %v157_v6 = vpop.f32.mrf.mxu0 }
  0xcd   :  { %2159 = vpow2.f32 %v1694_v40 }
  0xd8   :  { %v2158_v47 = vpop.eup %2157 }
  0xd9   :  { %v383_v54 = vadd.f32 1.0, %v2158_v47 }
  0xda   :  { %v2160_v4 = vpop.eup %2159 }
  0xdb   :  { %2161 = vrcp.f32 %v383_v54  ;;  %v384_v9 = vadd.f32 1.0, %v2160_v4  ;;  %v3630_v54 = vld [vmem:[#allocation6_spill] sm:$0xff] }
  0xdd   :  { %2163 = vrcp.f32 %v384_v9  ;;  %v3628_v9 = vmov 0.0  }
  0xe8   :  { %v2162_v7 = vpop.eup %2161 }
  0xe9   :  { %v395_v26 = vmul.f32 %v2162_v7, %v2746_v5  ;;  %v2821_v7 = vpop.f32.mrf.mxu0 }
  0xea   :  { %v2164_v0 = vpop.eup %2163  ;;  %3631 = vst [vmem:[#allocation15_spill] sm:$0xff] %v2821_v7 }
  0xeb   :  { %v396_v33 = vadd.f32 %v395_v26, %v263_v8  ;;  %v398_v40 = vsub.f32 1.0, %v2164_v0  ;;  %v2823_v8 = vpop.f32.mrf.mxu0 }
  0xec   :  { %3632 = vst [vmem:[#allocation16_spill] sm:$0xff] %v2823_v8 }
  0xed   :  { %2165 = vtanh.f32 %v396_v33  ;;  %v2825_v26 = vpop.f32.mrf.mxu0 }
  0xee   :  { %3633 = vst [vmem:[#allocation17_spill] sm:$0xff] %v2825_v26 }
  0xef   :  { %v2827_v33 = vpop.f32.mrf.mxu0 }
  0xf0   :  { %3634 = vst [vmem:[#allocation18_spill] sm:$0xff] %v2827_v33 }
  0xf1   :  { %v2829_v0 = vpop.f32.mrf.mxu0 }
  0xf2   :  { %3635 = vst [vmem:[#allocation19_spill] sm:$0xff] %v2829_v0 }
  0xfa   :  { %v2166_v47 = vpop.eup %2165 }
  0xfb   :  { %v2750_v4 = vmul.f32 %v2166_v47, %v398_v40  ;;  %v2831_v40 = vpop.f32.mrf.mxu0  ;;  %v2833_v47 = vpop.f32.mrf.mxu1 }
  0xfc   :  { %3636 = vst [vmem:[#allocation20_spill] sm:$0xff] %v2831_v40  ;;  %3637 = vst [vmem:[#allocation21_spill] sm:$0xff] %v2833_v47 }
  0xfd   :  { %468 = vmatmul.mubr.f32.vlgmr.msra.gmra.mxu0 %v2750_v4  ;;  %1907 = vmatmul.mubr.f32.vlgmr.msra.gmra.mxu1 %v2750_v4 }
  0xfe   :  { %570 = vmatpush1.msra.mxu0 %v2396_v10  ;;  %1910 = vmatpush3.msra.mxu1 %v2401_v11 }
  0xff   :  { %571 = vmatprep.subr.mxu0 %v2407_v12  ;;  %1911 = vmatprep.subr.mxu1 %v3628_v9 }
 0x100   :  { %572 = vmatpush1.msra.mxu0 %v2414_v13  ;;  %1912 = vmatpush3.msra.mxu1 %v2420_v14 }
 0x101   :  { %573 = vmatprep.subr.mxu0 %v2426_v15  ;;  %1913 = vmatprep.subr.mxu1 %v3628_v9 }
 0x102   :  { %574 = vmatpush1.msra.mxu0 %v2433_v16  ;;  %1914 = vmatpush3.msra.mxu1 %v2439_v17 }
 0x103   :  { %575 = vmatprep.subr.mxu0 %v2445_v18  ;;  %1915 = vmatprep.subr.mxu1 %v3628_v9 }
 0x104   :  { %576 = vmatpush1.msra.mxu0 %v2456_v20  ;;  %1916 = vmatpush3.msra.mxu1 %v2461_v21 }
 0x105   :  { %577 = vmatprep.subr.mxu0 %v2468_v22  ;;  %1917 = vmatprep.subr.mxu1 %v3628_v9 }
 0x106   :  { %578 = vmatpush1.msra.mxu0 %v2475_v23  ;;  %1918 = vmatpush3.msra.mxu1 %v2480_v24 }
 0x107   :  { %579 = vmatprep.subr.mxu0 %v2487_v25  ;;  %1919 = vmatprep.subr.mxu1 %v3628_v9 }
 0x108   :  { %580 = vmatpush1.msra.mxu0 %v2497_v27  ;;  %1920 = vmatpush3.msra.mxu1 %v2502_v28 }
 0x109   :  { %581 = vmatprep.subr.mxu0 %v2509_v29  ;;  %1921 = vmatprep.subr.mxu1 %v3628_v9 }
 0x10a   :  { %582 = vmatpush1.msra.mxu0 %v2516_v30  ;;  %1922 = vmatpush3.msra.mxu1 %v2528_v32 }
 0x10b   :  { %583 = vmatprep.subr.mxu0 %v2523_v31  ;;  %1923 = vmatprep.subr.mxu1 %v3628_v9 }
 0x10c   :  { %584 = vmatpush1.msra.mxu0 %v2538_v34  ;;  %1924 = vmatpush3.msra.mxu1 %v2550_v36 }
 0x10d   :  { %585 = vmatprep.subr.mxu0 %v2545_v35  ;;  %1925 = vmatprep.subr.mxu1 %v3628_v9 }
 0x10e   :  { %586 = vmatpush1.msra.mxu0 %v2557_v37  ;;  %1926 = vmatpush3.msra.mxu1 %v2571_v39 }
 0x10f   :  { %587 = vmatprep.subr.mxu0 %v2564_v38  ;;  %1927 = vmatprep.subr.mxu1 %v3628_v9 }
 0x110   :  { %588 = vmatpush1.msra.mxu0 %v2581_v41  ;;  %1928 = vmatpush3.msra.mxu1 %v2595_v43 }
 0x111   :  { %589 = vmatprep.subr.mxu0 %v2588_v42  ;;  %1929 = vmatprep.subr.mxu1 %v3628_v9 }
 0x112   :  { %590 = vmatpush1.msra.mxu0 %v2600_v44  ;;  %1930 = vmatpush3.msra.mxu1 %v2616_v46 }
 0x113   :  { %591 = vmatprep.subr.mxu0 %v2609_v45  ;;  %1931 = vmatprep.subr.mxu1 %v3628_v9 }
 0x114   :  { %592 = vmatpush1.msra.mxu0 %v2626_v48  ;;  %1932 = vmatpush3.msra.mxu1 %v2640_v50 }
 0x115   :  { %593 = vmatprep.subr.mxu0 %v2633_v49  ;;  %1933 = vmatprep.subr.mxu1 %v3628_v9 }
 0x116   :  { %594 = vmatpush1.msra.mxu0 %v2645_v51  ;;  %1934 = vmatpush3.msra.mxu1 %v2661_v53 }
 0x117   :  { %595 = vmatprep.subr.mxu0 %v2654_v52  ;;  %1935 = vmatprep.subr.mxu1 %v3628_v9 }
 0x118   :  { %596 = vmatpush1.msra.mxu0 %v2671_v55  ;;  %1936 = vmatpush3.msra.mxu1 %v2685_v57 }
 0x119   :  { %597 = vmatprep.subr.mxu0 %v2678_v56  ;;  %1937 = vmatprep.subr.mxu1 %v3628_v9 }
 0x11a   :  { %598 = vmatpush1.msra.mxu0 %v2690_v58  ;;  %1938 = vmatpush3.msra.mxu1 %v2704_v60 }
 0x11b   :  { %599 = vmatprep.subr.mxu0 %v2699_v59  ;;  %1939 = vmatprep.subr.mxu1 %v3628_v9 }
 0x11c   :  { %600 = vmatpush1.msra.mxu0 %v2711_v61  ;;  %633 = vmatprep.mubr.f32.mxu0 %v3628_v9 }
 0x11d   :  { %1940 = vmatpush3.msra.mxu1 %v3629_v2  ;;  %1941 = vmatprep.mubr.msk.f32.mxu1 %vm2313_vm1, %v3628_v9  ;;  %v2835_v2 = vpop.f32.mrf.mxu0 }
 0x11e   :  { %735 = vmatprep.subr.mxu0 %v3630_v54  ;;  %1944 = vmatprep.subr.mxu1 %v3628_v9  ;;  %3638 = vst [vmem:[#allocation22_spill] sm:$0xff] %v2835_v2  ;;  %v2837_v54 = vpop.f32.mrf.mxu1  ;;  %v156_v2 = vadd.f32 %v155_v63, %v2733_v3 }
 0x11f   :  { %3639 = vst [vmem:[#allocation23_spill] sm:$0xff] %v2837_v54  ;;  %v2839_v61 = vpop.f32.mrf.mxu0 }
 0x120   :  { %3640 = vst [vmem:[#allocation24_spill] sm:$0xff] %v2839_v61  ;;  %v2841_v59 = vpop.f32.mrf.mxu1 }
 0x121   :  { %3641 = vst [vmem:[#allocation25_spill] sm:$0xff] %v2841_v59  ;;  %v2843_v7 = vpop.f32.mrf.mxu0 }
 0x122   :  { %3642 = vst [vmem:[#allocation26_spill] sm:$0xff] %v2843_v7  ;;  %v2845_v8 = vpop.f32.mrf.mxu1 }
 0x123   :  { %3643 = vst [vmem:[#allocation27_spill] sm:$0xff] %v2845_v8  ;;  %v2847_v26 = vpop.f32.mrf.mxu0  ;;  %v158_v8 = vadd.f32 %v157_v6, %v2736_v19 }
 0x124   :  { %3644 = vst [vmem:[#allocation28_spill] sm:$0xff] %v2847_v26  ;;  %v2849_v33 = vpop.f32.mrf.mxu1 }
 0x125   :  { %3645 = vst [vmem:[#allocation29_spill] sm:$0xff] %v2849_v33  ;;  %v2851_v0 = vpop.f32.mrf.mxu0 }
 0x126   :  { %3646 = vst [vmem:[#allocation30_spill] sm:$0xff] %v2851_v0  ;;  %v2853_v40 = vpop.f32.mrf.mxu1 }
 0x127   :  { %3647 = vst [vmem:[#allocation31_spill] sm:$0xff] %v2853_v40  ;;  %v2855_v47 = vpop.f32.mrf.mxu0 }
 0x128   :  { %3648 = vst [vmem:[#allocation32_spill] sm:$0xff] %v2855_v47 }
 0x1bd   :  { %v469_v54 = vpop.f32.mrf.mxu0  ;;  %v540_v61 = vpop.f32.mrf.mxu1 }
 0x1be   :  { %v544_v60 = vadd.f32 %v469_v54, %v156_v2  ;;  %v558_v47 = vadd.f32 %v2746_v5, %v540_v61  ;;  %v268_v2 = vadd.f32 %v2739_v1, %v2741_v62  ;;  %v3650_v61 = vld [vmem:[#allocation7_spill] sm:$0xff]  ;;  %v3651_v1 = vld [vmem:[#allocation9_spill] sm:$0xff] }
 0x1bf   :  { %v1908_v59 = vpop.f32.mrf.mxu1  ;;  %v471_v7 = vpop.f32.mrf.mxu0 }
 0x1c0   :  { %v1696_v58 = vmul.f32 -1.442695, %v544_v60  ;;  %v545_v26 = vadd.f32 %v471_v7, %v158_v8 }
 0x1c2   :  { %2167 = vpow2.f32 %v1696_v58  ;;  %v1697_v56 = vmul.f32 -1.442695, %v545_v26  ;;  %v3653_v26 = vld [vmem:[#allocation10_spill] sm:$0xff] }
 0x1c4   :  { %2169 = vpow2.f32 %v1697_v56 }
 0x1cf   :  { %v2168_v33 = vpop.eup %2167 }
 0x1d0   :  { %v552_v0 = vadd.f32 1.0, %v2168_v33  ;;  %v3654_v33 = vld [vmem:[#allocation12_spill] sm:$0xff] }
 0x1d1   :  { %v2170_v40 = vpop.eup %2169 }
 0x1d2   :  { %2171 = vrcp.f32 %v552_v0  ;;  %v553_v57 = vadd.f32 1.0, %v2170_v40  ;;  %v3655_v0 = vld [vmem:[#allocation13_spill] sm:$0xff]  ;;  %v3656_v40 = vld [vmem:[#allocation6_spill] sm:$0xff] }
 0x1d4   :  { %2173 = vrcp.f32 %v553_v57  ;;  %v3649_v57 = vld [vmem:[#allocation8_spill] sm:$0xff] }
 0x1df   :  { %v2172_v63 = vpop.eup %2171 }
 0x1e0   :  { %v559_v59 = vmul.f32 %v2172_v63, %v558_v47  ;;  %v3657_v47 = vld [vmem:[#allocation15_spill] sm:$0xff] }
 0x1e1   :  { %v2174_v54 = vpop.eup %2173  ;;  %v162_v63 = vadd.f32 %v3657_v47, %v2733_v3 }
 0x1e2   :  { %v560_v60 = vadd.f32 %v559_v59, %v268_v2  ;;  %v562_v58 = vsub.f32 1.0, %v2174_v54  ;;  %v564_v56 = vmul.f32 %v2174_v54, %v2750_v4  ;;  %v3652_v4 = vld [vmem:[#allocation11_spill] sm:$0xff] }
 0x1e4   :  { %2175 = vtanh.f32 %v560_v60 }
 0x1f1   :  { %v2176_v6 = vpop.eup %2175 }
 0x1f2   :  { %v563_v7 = vmul.f32 %v2176_v6, %v562_v58 }
 0x1f4   :  { %v2863_v8 = vadd.f32 %v564_v56, %v563_v7  ;;  %v3658_v7 = vld [vmem:[#allocation16_spill] sm:$0xff] }
 0x1f5   :  { %v164_v56 = vadd.f32 %v3658_v7, %v2736_v19 }
 0x1f6   :  { %634 = vmatmul.mubr.f32.vlgmr.msra.gmra.mxu0 %v2863_v8  ;;  %1942 = vmatmul.mubr.f32.vlgmr.msra.gmra.mxu1 %v2863_v8 }
 0x1f7   :  { %736 = vmatpush1.msra.mxu0 %v2396_v10  ;;  %1945 = vmatpush3.msra.mxu1 %v2401_v11 }
 0x1f8   :  { %737 = vmatprep.subr.mxu0 %v2407_v12  ;;  %1946 = vmatprep.subr.mxu1 %v3628_v9 }
 0x1f9   :  { %738 = vmatpush1.msra.mxu0 %v2414_v13  ;;  %1947 = vmatpush3.msra.mxu1 %v2420_v14 }
 0x1fa   :  { %739 = vmatprep.subr.mxu0 %v2426_v15  ;;  %1948 = vmatprep.subr.mxu1 %v3628_v9 }
 0x1fb   :  { %740 = vmatpush1.msra.mxu0 %v2433_v16  ;;  %1949 = vmatpush3.msra.mxu1 %v2439_v17 }
 0x1fc   :  { %741 = vmatprep.subr.mxu0 %v2445_v18  ;;  %1950 = vmatprep.subr.mxu1 %v3628_v9 }
 0x1fd   :  { %742 = vmatpush1.msra.mxu0 %v2456_v20  ;;  %1951 = vmatpush3.msra.mxu1 %v2461_v21 }
 0x1fe   :  { %743 = vmatprep.subr.mxu0 %v2468_v22  ;;  %1952 = vmatprep.subr.mxu1 %v3628_v9 }
 0x1ff   :  { %744 = vmatpush1.msra.mxu0 %v2475_v23  ;;  %1953 = vmatpush3.msra.mxu1 %v2480_v24 }
 0x200   :  { %745 = vmatprep.subr.mxu0 %v2487_v25  ;;  %1954 = vmatprep.subr.mxu1 %v3628_v9 }
 0x201   :  { %746 = vmatpush1.msra.mxu0 %v2497_v27  ;;  %1955 = vmatpush3.msra.mxu1 %v2502_v28 }
 0x202   :  { %747 = vmatprep.subr.mxu0 %v2509_v29  ;;  %1956 = vmatprep.subr.mxu1 %v3628_v9 }
 0x203   :  { %748 = vmatpush1.msra.mxu0 %v2516_v30  ;;  %1957 = vmatpush3.msra.mxu1 %v2528_v32 }
 0x204   :  { %749 = vmatprep.subr.mxu0 %v2523_v31  ;;  %1958 = vmatprep.subr.mxu1 %v3628_v9 }
 0x205   :  { %750 = vmatpush1.msra.mxu0 %v2538_v34  ;;  %1959 = vmatpush3.msra.mxu1 %v2550_v36 }
 0x206   :  { %751 = vmatprep.subr.mxu0 %v2545_v35  ;;  %1960 = vmatprep.subr.mxu1 %v3628_v9 }
 0x207   :  { %752 = vmatpush1.msra.mxu0 %v2557_v37  ;;  %1961 = vmatpush3.msra.mxu1 %v2571_v39 }
 0x208   :  { %753 = vmatprep.subr.mxu0 %v2564_v38  ;;  %1962 = vmatprep.subr.mxu1 %v3628_v9 }
 0x209   :  { %754 = vmatpush1.msra.mxu0 %v2581_v41  ;;  %1963 = vmatpush3.msra.mxu1 %v2595_v43 }
 0x20a   :  { %755 = vmatprep.subr.mxu0 %v2588_v42  ;;  %1964 = vmatprep.subr.mxu1 %v3628_v9 }
 0x20b   :  { %756 = vmatpush1.msra.mxu0 %v2600_v44  ;;  %1965 = vmatpush3.msra.mxu1 %v2616_v46 }
 0x20c   :  { %757 = vmatprep.subr.mxu0 %v2609_v45  ;;  %1966 = vmatprep.subr.mxu1 %v3628_v9 }
 0x20d   :  { %758 = vmatpush1.msra.mxu0 %v2626_v48  ;;  %1967 = vmatpush3.msra.mxu1 %v2640_v50 }
 0x20e   :  { %759 = vmatprep.subr.mxu0 %v2633_v49  ;;  %1968 = vmatprep.subr.mxu1 %v3628_v9 }
 0x20f   :  { %760 = vmatpush1.msra.mxu0 %v2645_v51  ;;  %1969 = vmatpush3.msra.mxu1 %v2661_v53 }
 0x210   :  { %761 = vmatprep.subr.mxu0 %v2654_v52  ;;  %1970 = vmatprep.subr.mxu1 %v3628_v9 }
 0x211   :  { %762 = vmatpush1.msra.mxu0 %v2671_v55  ;;  %1971 = vmatpush3.msra.mxu1 %v3649_v57 }
 0x212   :  { %763 = vmatprep.subr.mxu0 %v3650_v61  ;;  %1972 = vmatprep.subr.mxu1 %v3628_v9 }
 0x213   :  { %764 = vmatpush1.msra.mxu0 %v3651_v1  ;;  %1973 = vmatpush3.msra.mxu1 %v3652_v4 }
 0x214   :  { %765 = vmatprep.subr.mxu0 %v3653_v26  ;;  %1974 = vmatprep.subr.mxu1 %v3628_v9 }
 0x215   :  { %766 = vmatpush1.msra.mxu0 %v3654_v33  ;;  %799 = vmatprep.mubr.f32.mxu0 %v3628_v9 }
 0x216   :  { %1975 = vmatpush3.msra.mxu1 %v3655_v0  ;;  %1976 = vmatprep.mubr.msk.f32.mxu1 %vm2313_vm1, %v3628_v9 }
 0x217   :  { %901 = vmatprep.subr.mxu0 %v3656_v40  ;;  %1979 = vmatprep.subr.mxu1 %v3628_v9 }
 0x2b6   :  { %v635_v2 = vpop.f32.mrf.mxu0  ;;  %v706_v59 = vpop.f32.mrf.mxu1 }
 0x2b7   :  { %v710_v60 = vadd.f32 %v635_v2, %v162_v63  ;;  %v724_v47 = vadd.f32 %v2746_v5, %v706_v59  ;;  %v3659_v63 = vld [vmem:[#allocation23_spill] sm:$0xff]  ;;  %v3665_v59 = vld [vmem:[#allocation6_spill] sm:$0xff] }
 0x2b8   :  { %v1943_v54 = vpop.f32.mrf.mxu1  ;;  %v637_v6 = vpop.f32.mrf.mxu0  ;;  %v273_v2 = vadd.f32 %v3659_v63, %v2741_v62 }
 0x2b9   :  { %v1698_v58 = vmul.f32 -1.442695, %v710_v60  ;;  %v711_v0 = vadd.f32 %v637_v6, %v164_v56  ;;  %v3666_v56 = vld [vmem:[#allocation14_spill] sm:$0xff] }
 0x2bb   :  { %2177 = vpow2.f32 %v1698_v58  ;;  %v1699_v33 = vmul.f32 -1.442695, %v711_v0 }
 0x2bd   :  { %2179 = vpow2.f32 %v1699_v33 }
 0x2c8   :  { %v2178_v26 = vpop.eup %2177 }
 0x2c9   :  { %v718_v40 = vadd.f32 1.0, %v2178_v26 }
 0x2ca   :  { %v2180_v4 = vpop.eup %2179 }
 0x2cb   :  { %2181 = vrcp.f32 %v718_v40  ;;  %v719_v1 = vadd.f32 1.0, %v2180_v4  ;;  %v3663_v4 = vld [vmem:[#allocation12_spill] sm:$0xff]  ;;  %v3664_v40 = vld [vmem:[#allocation13_spill] sm:$0xff] }
 0x2cd   :  { %2183 = vrcp.f32 %v719_v1  ;;  %v3662_v1 = vld [vmem:[#allocation10_spill] sm:$0xff] }
 0x2d8   :  { %v2182_v3 = vpop.eup %2181 }
 0x2d9   :  { %v725_v60 = vmul.f32 %v2182_v3, %v724_v47  ;;  %v3660_v3 = vld [vmem:[#allocation9_spill] sm:$0xff] }
 0x2da   :  { %v2184_v7 = vpop.eup %2183  ;;  %v3667_v47 = vld [vmem:[#allocation17_spill] sm:$0xff] }
 0x2db   :  { %v726_v54 = vadd.f32 %v725_v60, %v273_v2  ;;  %v728_v58 = vsub.f32 1.0, %v2184_v7  ;;  %v730_v33 = vmul.f32 %v2184_v7, %v2863_v8  ;;  %v3661_v8 = vld [vmem:[#allocation11_spill] sm:$0xff]  ;;  %v168_v63 = vadd.f32 %v3667_v47, %v3666_v56 }
 0x2dd   :  { %2185 = vtanh.f32 %v726_v54 }
 0x2ea   :  { %v2186_v6 = vpop.eup %2185 }
 0x2eb   :  { %v729_v0 = vmul.f32 %v2186_v6, %v728_v58 }
 0x2ed   :  { %v2942_v26 = vadd.f32 %v730_v33, %v729_v0  ;;  %v3668_v0 = vld [vmem:[#allocation18_spill] sm:$0xff] }
 0x2ee   :  { %v170_v33 = vadd.f32 %v3668_v0, %v2736_v19 }
 0x2ef   :  { %800 = vmatmul.mubr.f32.vlgmr.msra.gmra.mxu0 %v2942_v26  ;;  %1977 = vmatmul.mubr.f32.vlgmr.msra.gmra.mxu1 %v2942_v26 }
 0x2f0   :  { %902 = vmatpush1.msra.mxu0 %v2396_v10  ;;  %1980 = vmatpush3.msra.mxu1 %v2401_v11 }
 0x2f1   :  { %903 = vmatprep.subr.mxu0 %v2407_v12  ;;  %1981 = vmatprep.subr.mxu1 %v3628_v9 }
 0x2f2   :  { %904 = vmatpush1.msra.mxu0 %v2414_v13  ;;  %1982 = vmatpush3.msra.mxu1 %v2420_v14 }
 0x2f3   :  { %905 = vmatprep.subr.mxu0 %v2426_v15  ;;  %1983 = vmatprep.subr.mxu1 %v3628_v9 }
 0x2f4   :  { %906 = vmatpush1.msra.mxu0 %v2433_v16  ;;  %1984 = vmatpush3.msra.mxu1 %v2439_v17 }
 0x2f5   :  { %907 = vmatprep.subr.mxu0 %v2445_v18  ;;  %1985 = vmatprep.subr.mxu1 %v3628_v9 }
 0x2f6   :  { %908 = vmatpush1.msra.mxu0 %v2456_v20  ;;  %1986 = vmatpush3.msra.mxu1 %v2461_v21 }
 0x2f7   :  { %909 = vmatprep.subr.mxu0 %v2468_v22  ;;  %1987 = vmatprep.subr.mxu1 %v3628_v9 }
 0x2f8   :  { %910 = vmatpush1.msra.mxu0 %v2475_v23  ;;  %1988 = vmatpush3.msra.mxu1 %v2480_v24 }
 0x2f9   :  { %911 = vmatprep.subr.mxu0 %v2487_v25  ;;  %1989 = vmatprep.subr.mxu1 %v3628_v9 }
 0x2fa   :  { %912 = vmatpush1.msra.mxu0 %v2497_v27  ;;  %1990 = vmatpush3.msra.mxu1 %v2502_v28 }
 0x2fb   :  { %913 = vmatprep.subr.mxu0 %v2509_v29  ;;  %1991 = vmatprep.subr.mxu1 %v3628_v9 }
 0x2fc   :  { %914 = vmatpush1.msra.mxu0 %v2516_v30  ;;  %1992 = vmatpush3.msra.mxu1 %v2528_v32 }
 0x2fd   :  { %915 = vmatprep.subr.mxu0 %v2523_v31  ;;  %1993 = vmatprep.subr.mxu1 %v3628_v9 }
 0x2fe   :  { %916 = vmatpush1.msra.mxu0 %v2538_v34  ;;  %1994 = vmatpush3.msra.mxu1 %v2550_v36 }
 0x2ff   :  { %917 = vmatprep.subr.mxu0 %v2545_v35  ;;  %1995 = vmatprep.subr.mxu1 %v3628_v9 }
 0x300   :  { %918 = vmatpush1.msra.mxu0 %v2557_v37  ;;  %1996 = vmatpush3.msra.mxu1 %v2571_v39 }
 0x301   :  { %919 = vmatprep.subr.mxu0 %v2564_v38  ;;  %1997 = vmatprep.subr.mxu1 %v3628_v9 }
 0x302   :  { %920 = vmatpush1.msra.mxu0 %v2581_v41  ;;  %1998 = vmatpush3.msra.mxu1 %v2595_v43 }
 0x303   :  { %921 = vmatprep.subr.mxu0 %v2588_v42  ;;  %1999 = vmatprep.subr.mxu1 %v3628_v9 }
 0x304   :  { %922 = vmatpush1.msra.mxu0 %v2600_v44  ;;  %2000 = vmatpush3.msra.mxu1 %v2616_v46 }
 0x305   :  { %923 = vmatprep.subr.mxu0 %v2609_v45  ;;  %2001 = vmatprep.subr.mxu1 %v3628_v9 }
 0x306   :  { %924 = vmatpush1.msra.mxu0 %v2626_v48  ;;  %2002 = vmatpush3.msra.mxu1 %v2640_v50 }
 0x307   :  { %925 = vmatprep.subr.mxu0 %v2633_v49  ;;  %2003 = vmatprep.subr.mxu1 %v3628_v9 }
 0x308   :  { %926 = vmatpush1.msra.mxu0 %v2645_v51  ;;  %2004 = vmatpush3.msra.mxu1 %v2661_v53 }
 0x309   :  { %927 = vmatprep.subr.mxu0 %v2654_v52  ;;  %2005 = vmatprep.subr.mxu1 %v3628_v9 }
 0x30a   :  { %928 = vmatpush1.msra.mxu0 %v2671_v55  ;;  %2006 = vmatpush3.msra.mxu1 %v3649_v57 }
 0x30b   :  { %929 = vmatprep.subr.mxu0 %v3650_v61  ;;  %2007 = vmatprep.subr.mxu1 %v3628_v9 }
 0x30c   :  { %930 = vmatpush1.msra.mxu0 %v3660_v3  ;;  %2008 = vmatpush3.msra.mxu1 %v3661_v8 }
 0x30d   :  { %931 = vmatprep.subr.mxu0 %v3662_v1  ;;  %2009 = vmatprep.subr.mxu1 %v3628_v9 }
 0x30e   :  { %932 = vmatpush1.msra.mxu0 %v3663_v4  ;;  %965 = vmatprep.mubr.f32.mxu0 %v3628_v9 }
 0x30f   :  { %2010 = vmatpush3.msra.mxu1 %v3664_v40  ;;  %2011 = vmatprep.mubr.msk.f32.mxu1 %vm2313_vm1, %v3628_v9 }
 0x310   :  { %1067 = vmatprep.subr.mxu0 %v3665_v59  ;;  %2014 = vmatprep.subr.mxu1 %v3628_v9 }
 0x3af   :  { %v801_v2 = vpop.f32.mrf.mxu0  ;;  %v872_v60 = vpop.f32.mrf.mxu1 }
 0x3b0   :  { %v876_v54 = vadd.f32 %v801_v2, %v168_v63  ;;  %v890_v47 = vadd.f32 %v2746_v5, %v872_v60  ;;  %v3669_v63 = vld [vmem:[#allocation21_spill] sm:$0xff]  ;;  %v3181_v60 = vld [vmem:[%s3587_s2 + $0x110] sm:$0xff] }
 0x3b1   :  { %v1978_v7 = vpop.f32.mrf.mxu1  ;;  %v803_v6 = vpop.f32.mrf.mxu0  ;;  %v278_v2 = vadd.f32 %v3669_v63, %v2741_v62  ;;  %v3207_v63 = vld [vmem:[%s3587_s2 + $0xf0] sm:$0xff] }
 0x3b2   :  { %v1700_v58 = vmul.f32 -1.442695, %v876_v54  ;;  %v877_v40 = vadd.f32 %v803_v6, %v170_v33  ;;  %v3188_v33 = vld [vmem:[%s3587_s2 + $0x108] sm:$0xff] }
 0x3b4   :  { %2187 = vpow2.f32 %v1700_v58  ;;  %v1701_v4 = vmul.f32 -1.442695, %v877_v40 }
 0x3b6   :  { %2189 = vpow2.f32 %v1701_v4 }
 0x3c1   :  { %v2188_v1 = vpop.eup %2187 }
 0x3c2   :  { %v884_v59 = vadd.f32 1.0, %v2188_v1 }
 0x3c3   :  { %v2190_v8 = vpop.eup %2189 }
 0x3c4   :  { %2191 = vrcp.f32 %v884_v59  ;;  %v885_v3 = vadd.f32 1.0, %v2190_v8  ;;  %v3169_v8 = vld [vmem:[%s3587_s2 + $0x120] sm:$0xff]  ;;  %v3194_v59 = vld [vmem:[%s3587_s2 + $0x118] sm:$0xff] }
 0x3c6   :  { %2193 = vrcp.f32 %v885_v3  ;;  %v3162_v3 = vld [vmem:[%s3587_s2 + $0x128] sm:$0xff] }
 0x3d1   :  { %v2192_v56 = vpop.eup %2191 }
 0x3d2   :  { %v891_v54 = vmul.f32 %v2192_v56, %v890_v47  ;;  %v3175_v56 = vld [vmem:[%s3587_s2 + $0x130] sm:$0xff]  ;;  %v3200_v47 = vld [vmem:[%s3587_s2 + $0xf8] sm:$0xff] }
 0x3d3   :  { %v2194_v0 = vpop.eup %2193 }
 0x3d4   :  { %v892_v7 = vadd.f32 %v891_v54, %v278_v2  ;;  %v894_v58 = vsub.f32 1.0, %v2194_v0  ;;  %v896_v4 = vmul.f32 %v2194_v0, %v2942_v26  ;;  %v3156_v26 = vld [vmem:[%s3587_s2 + $0x148] sm:$0xff]  ;;  %v3213_v2 = vld [vmem:[%s3587_s2 + $0x100] sm:$0xff] }
 0x3d5   :  { %v3219_v54 = vld [vmem:[%s3587_s2 + $0xe0] sm:$0xff]  ;;  %v3232_v0 = vld [vmem:[%s3587_s2 + $0xe8] sm:$0xff] }
 0x3d6   :  { %2195 = vtanh.f32 %v892_v7  ;;  %v3226_v7 = vld [vmem:[%s3587_s2 + $0xd8] sm:$0xff] }
 0x3e3   :  { %v2196_v6 = vpop.eup %2195 }
 0x3e4   :  { %v895_v40 = vmul.f32 %v2196_v6, %v894_v58  ;;  %v3238_v58 = vld [vmem:[%s3587_s2 + $0xc8] sm:$0xff]  ;;  %v3245_v6 = vld [vmem:[%s3587_s2 + $0xc0] sm:$0xff] }
 0x3e6   :  { %v3021_v1 = vadd.f32 %v896_v4, %v895_v40  ;;  %v3251_v40 = vld [vmem:[%s3587_s2 + $0xd0] sm:$0xff] }
 0x3e7   :  { %v3257_v4 = vld [vmem:[%s3587_s2 + $0xb0] sm:$0xff] }
 0x3e8   :  { %966 = vmatmul.mubr.f32.vlgmr.msra.gmra.mxu0 %v3021_v1  ;;  %2012 = vmatmul.mubr.f32.vlgmr.msra.gmra.mxu1 %v3021_v1 }
 0x3e9   :  { %1068 = vmatpush1.msra.mxu0 %v2396_v10  ;;  %2015 = vmatpush3.msra.mxu1 %v2401_v11  ;;  %v3670_v10 = vld [vmem:[#allocation9_spill] sm:$0xff]  ;;  %v3671_v11 = vld [vmem:[#allocation11_spill] sm:$0xff] }
 0x3ea   :  { %1069 = vmatprep.subr.mxu0 %v2407_v12  ;;  %2016 = vmatprep.subr.mxu1 %v3628_v9  ;;  %v3672_v12 = vld [vmem:[#allocation10_spill] sm:$0xff] }
 0x3eb   :  { %1070 = vmatpush1.msra.mxu0 %v2414_v13  ;;  %2017 = vmatpush3.msra.mxu1 %v2420_v14  ;;  %v3673_v13 = vld [vmem:[#allocation12_spill] sm:$0xff]  ;;  %v3674_v14 = vld [vmem:[#allocation13_spill] sm:$0xff] }
 0x3ec   :  { %1071 = vmatprep.subr.mxu0 %v2426_v15  ;;  %2018 = vmatprep.subr.mxu1 %v3628_v9  ;;  %v3093_v15 = vld [vmem:[%s3587_s2 + $0x170] sm:$0xff] }
 0x3ed   :  { %1072 = vmatpush1.msra.mxu0 %v2433_v16  ;;  %2019 = vmatpush3.msra.mxu1 %v2439_v17  ;;  %v3675_v16 = vld [vmem:[#allocation14_spill] sm:$0xff]  ;;  %v3676_v17 = vld [vmem:[#allocation19_spill] sm:$0xff] }
 0x3ee   :  { %1073 = vmatprep.subr.mxu0 %v2445_v18  ;;  %2020 = vmatprep.subr.mxu1 %v3628_v9  ;;  %v174_v18 = vadd.f32 %v3676_v17, %v3675_v16  ;;  %v3302_v17 = vld [vmem:[%s3587_s2 + $0x78] sm:$0xff] }
 0x3ef   :  { %1074 = vmatpush1.msra.mxu0 %v2456_v20  ;;  %2021 = vmatpush3.msra.mxu1 %v2461_v21 }
 0x3f0   :  { %1075 = vmatprep.subr.mxu0 %v2468_v22  ;;  %2022 = vmatprep.subr.mxu1 %v3628_v9 }
 0x3f1   :  { %1076 = vmatpush1.msra.mxu0 %v2475_v23  ;;  %2023 = vmatpush3.msra.mxu1 %v2480_v24 }
 0x3f2   :  { %1077 = vmatprep.subr.mxu0 %v2487_v25  ;;  %2024 = vmatprep.subr.mxu1 %v3628_v9 }
 0x3f3   :  { %1078 = vmatpush1.msra.mxu0 %v2497_v27  ;;  %2025 = vmatpush3.msra.mxu1 %v2502_v28  ;;  %v3677_v27 = vld [vmem:[#allocation20_spill] sm:$0xff] }
 0x3f4   :  { %1079 = vmatprep.subr.mxu0 %v2509_v29  ;;  %2026 = vmatprep.subr.mxu1 %v3628_v9  ;;  %v176_v28 = vadd.f32 %v3677_v27, %v2736_v19  ;;  %v3352_v27 = vld [vmem:[%s3587_s2 + $0x38] sm:$0xff] }
 0x3f5   :  { %1080 = vmatpush1.msra.mxu0 %v2516_v30  ;;  %2027 = vmatpush3.msra.mxu1 %v2528_v32 }
 0x3f6   :  { %1081 = vmatprep.subr.mxu0 %v2523_v31  ;;  %2028 = vmatprep.subr.mxu1 %v3628_v9 }
 0x3f7   :  { %1082 = vmatpush1.msra.mxu0 %v2538_v34  ;;  %2029 = vmatpush3.msra.mxu1 %v2550_v36 }
 0x3f8   :  { %1083 = vmatprep.subr.mxu0 %v2545_v35  ;;  %2030 = vmatprep.subr.mxu1 %v3628_v9 }
 0x3f9   :  { %1084 = vmatpush1.msra.mxu0 %v2557_v37  ;;  %2031 = vmatpush3.msra.mxu1 %v2571_v39 }
 0x3fa   :  { %1085 = vmatprep.subr.mxu0 %v2564_v38  ;;  %2032 = vmatprep.subr.mxu1 %v3628_v9  ;;  %v3678_v38 = vld [vmem:[#allocation27_spill] sm:$0xff] }
 0x3fb   :  { %1086 = vmatpush1.msra.mxu0 %v2581_v41  ;;  %2033 = vmatpush3.msra.mxu1 %v2595_v43  ;;  %v283_v39 = vadd.f32 %v3678_v38, %v2741_v62 }
 0x3fc   :  { %1087 = vmatprep.subr.mxu0 %v2588_v42  ;;  %2034 = vmatprep.subr.mxu1 %v3628_v9 }
 0x3fd   :  { %1088 = vmatpush1.msra.mxu0 %v2600_v44  ;;  %2035 = vmatpush3.msra.mxu1 %v2616_v46 }
 0x3fe   :  { %1089 = vmatprep.subr.mxu0 %v2609_v45  ;;  %2036 = vmatprep.subr.mxu1 %v3628_v9 }
 0x3ff   :  { %1090 = vmatpush1.msra.mxu0 %v2626_v48  ;;  %2037 = vmatpush3.msra.mxu1 %v2640_v50  ;;  %v3112_v50 = vld [vmem:[%s3587_s2 + $0x168] sm:$0xff] }
 0x400   :  { %1091 = vmatprep.subr.mxu0 %v2633_v49  ;;  %2038 = vmatprep.subr.mxu1 %v3628_v9 }
 0x401   :  { %1092 = vmatpush1.msra.mxu0 %v2645_v51  ;;  %2039 = vmatpush3.msra.mxu1 %v2661_v53  ;;  %v3118_v51 = vld [vmem:[%s3587_s2 + $0x178] sm:$0xff]  ;;  %v3131_v53 = vld [vmem:[%s3587_s2 + $0x150] sm:$0xff] }
 0x402   :  { %1093 = vmatprep.subr.mxu0 %v2654_v52  ;;  %2040 = vmatprep.subr.mxu1 %v3628_v9  ;;  %v3124_v52 = vld [vmem:[%s3587_s2 + $0x158] sm:$0xff] }
 0x403   :  { %1094 = vmatpush1.msra.mxu0 %v2671_v55  ;;  %2041 = vmatpush3.msra.mxu1 %v3649_v57  ;;  %v3137_v55 = vld [vmem:[%s3587_s2 + $0x160] sm:$0xff] }
 0x404   :  { %1095 = vmatprep.subr.mxu0 %v3650_v61  ;;  %2042 = vmatprep.subr.mxu1 %v3628_v9  ;;  %v3143_v57 = vld [vmem:[%s3587_s2 + $0x140] sm:$0xff]  ;;  %v3150_v61 = vld [vmem:[%s3587_s2 + $0x138] sm:$0xff] }
 0x405   :  { %1096 = vmatpush1.msra.mxu0 %v3670_v10  ;;  %2043 = vmatpush3.msra.mxu1 %v3671_v11  ;;  %v3270_v10 = vld [vmem:[%s3587_s2 + $0xb8] sm:$0xff] }
 0x406   :  { %1097 = vmatprep.subr.mxu0 %v3672_v12  ;;  %2044 = vmatprep.subr.mxu1 %v3628_v9  ;;  %v3276_v11 = vld [vmem:[%s3587_s2 + $0x98] sm:$0xff]  ;;  %v3283_v12 = vld [vmem:[%s3587_s2 + $0x90] sm:$0xff] }
 0x407   :  { %1098 = vmatpush1.msra.mxu0 %v3673_v13  ;;  %1131 = vmatprep.mubr.f32.mxu0 %v3628_v9  ;;  %v3289_v13 = vld [vmem:[%s3587_s2 + $0xa0] sm:$0xff] }
 0x408   :  { %2045 = vmatpush3.msra.mxu1 %v3674_v14  ;;  %2046 = vmatprep.mubr.msk.f32.mxu1 %vm2313_vm1, %v3628_v9  ;;  %v3295_v14 = vld [vmem:[%s3587_s2 + $0x80] sm:$0xff] }
 0x409   :  { %1233 = vmatprep.subr.mxu0 %v3093_v15  ;;  %2049 = vmatprep.subr.mxu1 %v3628_v9 }
 0x4a8   :  { %v967_v20 = vpop.f32.mrf.mxu0  ;;  %v1038_v21 = vpop.f32.mrf.mxu1 }
 0x4a9   :  { %v1042_v22 = vadd.f32 %v967_v20, %v174_v18  ;;  %v1056_v36 = vadd.f32 %v2746_v5, %v1038_v21  ;;  %v3308_v18 = vld [vmem:[%s3587_s2 + $0x88] sm:$0xff]  ;;  %v3321_v21 = vld [vmem:[%s3587_s2 + $0x60] sm:$0xff] }
 0x4aa   :  { %v2013_v23 = vpop.f32.mrf.mxu1  ;;  %v969_v25 = vpop.f32.mrf.mxu0  ;;  %v3314_v20 = vld [vmem:[%s3587_s2 + $0x68] sm:$0xff] }
 0x4ab   :  { %v1702_v24 = vmul.f32 -1.442695, %v1042_v22  ;;  %v1043_v29 = vadd.f32 %v969_v25, %v176_v28  ;;  %v3327_v22 = vld [vmem:[%s3587_s2 + $0x70] sm:$0xff]  ;;  %v3346_v25 = vld [vmem:[%s3587_s2 + $0x58] sm:$0xff] }
 0x4ac   :  { %v3333_v23 = vld [vmem:[%s3587_s2 + $0x50] sm:$0xff] }
 0x4ad   :  { %2197 = vpow2.f32 %v1702_v24  ;;  %v1703_v30 = vmul.f32 -1.442695, %v1043_v29  ;;  %v3340_v24 = vld [vmem:[%s3587_s2 + $0x48] sm:$0xff]  ;;  %v3359_v28 = vld [vmem:[%s3587_s2 + $0x30] sm:$0xff]  ;;  %v3365_v29 = vld [vmem:[%s3587_s2 + $0x40] sm:$0xff] }
 0x4af   :  { %2199 = vpow2.f32 %v1703_v30  ;;  %v3371_v30 = vld [vmem:[%s3587_s2 + $0x20] sm:$0xff] }
 0x4ba   :  { %v2198_v31 = vpop.eup %2197 }
 0x4bb   :  { %v1050_v32 = vadd.f32 1.0, %v2198_v31  ;;  %v3378_v31 = vld [vmem:[%s3587_s2 + $0x18] sm:$0xff] }
 0x4bc   :  { %v2200_v34 = vpop.eup %2199  ;;  %3679 = vst [vmem:[#allocation8_spill] sm:$0xff] %v3378_v31 }
 0x4bd   :  { %2201 = vrcp.f32 %v1050_v32  ;;  %v1051_v35 = vadd.f32 1.0, %v2200_v34  ;;  %v3384_v32 = vld [vmem:[%s3587_s2 + $0x28] sm:$0xff] }
 0x4be   :  { %3680 = vst [vmem:[#allocation7_spill] sm:$0xff] %v3384_v32  ;;  %v3390_v34 = vld [vmem:[%s3587_s2 + $0x8] sm:$0xff] }
 0x4bf   :  { %2203 = vrcp.f32 %v1051_v35  ;;  %3681 = vst [vmem:[#allocation15_spill] sm:$0xff] %v3390_v34  ;;  %v3397_v35 = vld [vmem:[%s3587_s2] sm:$0xff] }
 0x4c0   :  { %3682 = vst [vmem:[#allocation16_spill] sm:$0xff] %v3397_v35 }
 0x4ca   :  { %v2202_v37 = vpop.eup %2201 }
 0x4cb   :  { %v1057_v41 = vmul.f32 %v2202_v37, %v1056_v36  ;;  %v3404_v36 = vld [vmem:[%s3587_s2 + $0x10] sm:$0xff]  ;;  %v3684_v37 = vld [vmem:[#allocation22_spill] sm:$0xff] }
 0x4cc   :  { %v2204_v43 = vpop.eup %2203  ;;  %3683 = vst [vmem:[#allocation23_spill] sm:$0xff] %v3404_v36  ;;  %v180_v38 = vadd.f32 %v3684_v37, %v3675_v16 }
 0x4cd   :  { %v1058_v42 = vadd.f32 %v1057_v41, %v283_v39  ;;  %v1060_v44 = vsub.f32 1.0, %v2204_v43  ;;  %v1062_v48 = vmul.f32 %v2204_v43, %v3021_v1  ;;  %v3264_v1 = vld [vmem:[%s3587_s2 + $0xa8] sm:$0xff] }
 0x4cf   :  { %2205 = vtanh.f32 %v1058_v42 }
 0x4dc   :  { %v2206_v45 = vpop.eup %2205 }
 0x4dd   :  { %v1061_v46 = vmul.f32 %v2206_v45, %v1060_v44 }
 0x4df   :  { %v3105_v49 = vadd.f32 %v1062_v48, %v1061_v46  ;;  %v3685_v46 = vld [vmem:[#allocation24_spill] sm:$0xff] }
 0x4e0   :  { %v182_v48 = vadd.f32 %v3685_v46, %v2736_v19 }
 0x4e1   :  { %1132 = vmatmul.mubr.f32.vlgmr.msra.gmra.mxu0 %v3105_v49  ;;  %2047 = vmatmul.mubr.f32.vlgmr.msra.gmra.mxu1 %v3105_v49 }
 0x4e2   :  { %1234 = vmatpush1.msra.mxu0 %v3112_v50  ;;  %2050 = vmatpush3.msra.mxu1 %v3118_v51 }
 0x4e3   :  { %1235 = vmatprep.subr.mxu0 %v3124_v52  ;;  %2051 = vmatprep.subr.mxu1 %v3628_v9 }
 0x4e4   :  { %1236 = vmatpush1.msra.mxu0 %v3131_v53  ;;  %2052 = vmatpush3.msra.mxu1 %v3137_v55 }
 0x4e5   :  { %1237 = vmatprep.subr.mxu0 %v3143_v57  ;;  %2053 = vmatprep.subr.mxu1 %v3628_v9 }
 0x4e6   :  { %1238 = vmatpush1.msra.mxu0 %v3150_v61  ;;  %2054 = vmatpush3.msra.mxu1 %v3156_v26 }
 0x4e7   :  { %1239 = vmatprep.subr.mxu0 %v3162_v3  ;;  %2055 = vmatprep.subr.mxu1 %v3628_v9 }
 0x4e8   :  { %1240 = vmatpush1.msra.mxu0 %v3169_v8  ;;  %2056 = vmatpush3.msra.mxu1 %v3175_v56 }
 0x4e9   :  { %1241 = vmatprep.subr.mxu0 %v3181_v60  ;;  %2057 = vmatprep.subr.mxu1 %v3628_v9 }
 0x4ea   :  { %1242 = vmatpush1.msra.mxu0 %v3188_v33  ;;  %2058 = vmatpush3.msra.mxu1 %v3194_v59 }
 0x4eb   :  { %1243 = vmatprep.subr.mxu0 %v3200_v47  ;;  %2059 = vmatprep.subr.mxu1 %v3628_v9 }
 0x4ec   :  { %1244 = vmatpush1.msra.mxu0 %v3207_v63  ;;  %2060 = vmatpush3.msra.mxu1 %v3213_v2 }
 0x4ed   :  { %1245 = vmatprep.subr.mxu0 %v3219_v54  ;;  %2061 = vmatprep.subr.mxu1 %v3628_v9 }
 0x4ee   :  { %1246 = vmatpush1.msra.mxu0 %v3226_v7  ;;  %2062 = vmatpush3.msra.mxu1 %v3232_v0 }
 0x4ef   :  { %1247 = vmatprep.subr.mxu0 %v3238_v58  ;;  %2063 = vmatprep.subr.mxu1 %v3628_v9 }
 0x4f0   :  { %1248 = vmatpush1.msra.mxu0 %v3245_v6  ;;  %2064 = vmatpush3.msra.mxu1 %v3251_v40 }
 0x4f1   :  { %1249 = vmatprep.subr.mxu0 %v3257_v4  ;;  %2065 = vmatprep.subr.mxu1 %v3628_v9 }
 0x4f2   :  { %1250 = vmatpush1.msra.mxu0 %v3264_v1  ;;  %2066 = vmatpush3.msra.mxu1 %v3270_v10 }
 0x4f3   :  { %1251 = vmatprep.subr.mxu0 %v3276_v11  ;;  %2067 = vmatprep.subr.mxu1 %v3628_v9 }
 0x4f4   :  { %1252 = vmatpush1.msra.mxu0 %v3283_v12  ;;  %2068 = vmatpush3.msra.mxu1 %v3289_v13 }
 0x4f5   :  { %1253 = vmatprep.subr.mxu0 %v3295_v14  ;;  %2069 = vmatprep.subr.mxu1 %v3628_v9 }
 0x4f6   :  { %1254 = vmatpush1.msra.mxu0 %v3302_v17  ;;  %2070 = vmatpush3.msra.mxu1 %v3308_v18 }
 0x4f7   :  { %1255 = vmatprep.subr.mxu0 %v3314_v20  ;;  %2071 = vmatprep.subr.mxu1 %v3628_v9 }
 0x4f8   :  { %1256 = vmatpush1.msra.mxu0 %v3321_v21  ;;  %2072 = vmatpush3.msra.mxu1 %v3327_v22 }
 0x4f9   :  { %1257 = vmatprep.subr.mxu0 %v3333_v23  ;;  %2073 = vmatprep.subr.mxu1 %v3628_v9 }
 0x4fa   :  { %1258 = vmatpush1.msra.mxu0 %v3340_v24  ;;  %2074 = vmatpush3.msra.mxu1 %v3346_v25 }
 0x4fb   :  { %1259 = vmatprep.subr.mxu0 %v3352_v27  ;;  %2075 = vmatprep.subr.mxu1 %v3628_v9 }
 0x4fc   :  { %1260 = vmatpush1.msra.mxu0 %v3359_v28  ;;  %2076 = vmatpush3.msra.mxu1 %v3365_v29 }
 0x4fd   :  { %1261 = vmatprep.subr.mxu0 %v3371_v30  ;;  %2077 = vmatprep.subr.mxu1 %v3628_v9 }
 0x4fe   :  { %1262 = vmatpush1.msra.mxu0 %v3378_v31  ;;  %2078 = vmatpush3.msra.mxu1 %v3384_v32 }
 0x4ff   :  { %1263 = vmatprep.subr.mxu0 %v3390_v34  ;;  %2079 = vmatprep.subr.mxu1 %v3628_v9 }
 0x500   :  { %1264 = vmatpush1.msra.mxu0 %v3397_v35  ;;  %1297 = vmatprep.mubr.f32.mxu0 %v3628_v9 }
 0x501   :  { %2080 = vmatpush3.msra.mxu1 %v3404_v36  ;;  %2081 = vmatprep.mubr.msk.f32.mxu1 %vm2313_vm1, %v3628_v9 }
 0x502   :  { %1399 = vmatprep.subr.mxu0 %v3093_v15  ;;  %2084 = vmatprep.subr.mxu1 %v3628_v9 }
 0x5a1   :  { %v1133_v39 = vpop.f32.mrf.mxu0  ;;  %v1204_v41 = vpop.f32.mrf.mxu1 }
 0x5a2   :  { %v1208_v42 = vadd.f32 %v1133_v39, %v180_v38  ;;  %v1222_v37 = vadd.f32 %v2746_v5, %v1204_v41  ;;  %v3686_v38 = vld [vmem:[#allocation25_spill] sm:$0xff]  ;;  %v3687_v5 = vld [vmem:[#allocation8_spill] sm:$0xff] }
 0x5a3   :  { %v2048_v43 = vpop.f32.mrf.mxu1  ;;  %v1135_v45 = vpop.f32.mrf.mxu0  ;;  %v288_v39 = vadd.f32 %v3686_v38, %v2741_v62  ;;  %v1572_v41 = vld [vmem:[%s3590_s5 + $0x18] sm:$0xff]  ;;  %v3696_v38 = vld [vmem:[#allocation30_spill] sm:$0xff] }
 0x5a4   :  { %v1704_v44 = vmul.f32 -1.442695, %v1208_v42  ;;  %v1209_v36 = vadd.f32 %v1135_v45, %v182_v48  ;;  %v1571_v48 = vld [vmem:[%s3590_s5 + $0x10] sm:$0xff] }
 0x5a6   :  { %2207 = vpow2.f32 %v1704_v44  ;;  %v1705_v35 = vmul.f32 -1.442695, %v1209_v36 }
 0x5a8   :  { %2209 = vpow2.f32 %v1705_v35 }
 0x5b3   :  { %v2208_v34 = vpop.eup %2207 }
 0x5b4   :  { %v1216_v15 = vadd.f32 1.0, %v2208_v34 }
 0x5b5   :  { %v2210_v32 = vpop.eup %2209 }
 0x5b6   :  { %2211 = vrcp.f32 %v1216_v15  ;;  %v1217_v31 = vadd.f32 1.0, %v2210_v32  ;;  %v1573_v32 = vld [vmem:[%s3590_s5 + $0x20] sm:$0xff]  ;;  %v1570_v15 = vld [vmem:[%s3590_s5 + $0x8] sm:$0xff] }
 0x5b8   :  { %2213 = vrcp.f32 %v1217_v31  ;;  %v1574_v31 = vld [vmem:[%s3590_s5 + $0x28] sm:$0xff] }
 0x5c3   :  { %v2212_v16 = vpop.eup %2211 }
 0x5c4   :  { %v1223_v42 = vmul.f32 %v2212_v16, %v1222_v37  ;;  %v3688_v16 = vld [vmem:[#allocation7_spill] sm:$0xff]  ;;  %v1569_v37 = vld [vmem:[%s3590_s5] sm:$0xff] }
 0x5c5   :  { %v2214_v46 = vpop.eup %2213 }
 0x5c6   :  { %v1224_v43 = vadd.f32 %v1223_v42, %v288_v39  ;;  %v1226_v44 = vsub.f32 1.0, %v2214_v46  ;;  %v1228_v35 = vmul.f32 %v2214_v46, %v3105_v49  ;;  %v3689_v49 = vld [vmem:[#allocation15_spill] sm:$0xff] }
 0x5c8   :  { %2215 = vtanh.f32 %v1224_v43 }
 0x5d5   :  { %v2216_v45 = vpop.eup %2215 }
 0x5d6   :  { %v1227_v36 = vmul.f32 %v2216_v45, %v1226_v44 }
 0x5d8   :  { %v3419_v34 = vadd.f32 %v1228_v35, %v1227_v36  ;;  %v3697_v35 = vld [vmem:[#allocation32_spill] sm:$0xff] }
 0x5da   :  { %1298 = vmatmul.mubr.f32.vlgmr.msra.gmra.mxu0 %v3419_v34  ;;  %2082 = vmatmul.mubr.f32.vlgmr.msra.gmra.mxu1 %v3419_v34 }
 0x5db   :  { %1400 = vmatpush1.msra.mxu0 %v3112_v50  ;;  %2085 = vmatpush3.msra.mxu1 %v3118_v51  ;;  %v3690_v50 = vld [vmem:[#allocation16_spill] sm:$0xff]  ;;  %v3691_v51 = vld [vmem:[#allocation23_spill] sm:$0xff] }
 0x5dc   :  { %1401 = vmatprep.subr.mxu0 %v3124_v52  ;;  %2086 = vmatprep.subr.mxu1 %v3628_v9  ;;  %v3692_v52 = vld [vmem:[#allocation14_spill] sm:$0xff] }
 0x5dd   :  { %1402 = vmatpush1.msra.mxu0 %v3131_v53  ;;  %2087 = vmatpush3.msra.mxu1 %v3137_v55  ;;  %v3693_v53 = vld [vmem:[#allocation26_spill] sm:$0xff]  ;;  %v192_v39 = vadd.f32 %v3696_v38, %v3692_v52 }
 0x5de   :  { %1403 = vmatprep.subr.mxu0 %v3143_v57  ;;  %2088 = vmatprep.subr.mxu1 %v3628_v9  ;;  %v186_v55 = vadd.f32 %v3693_v53, %v3692_v52 }
 0x5df   :  { %1404 = vmatpush1.msra.mxu0 %v3150_v61  ;;  %2089 = vmatpush3.msra.mxu1 %v3156_v26 }
 0x5e0   :  { %1405 = vmatprep.subr.mxu0 %v3162_v3  ;;  %2090 = vmatprep.subr.mxu1 %v3628_v9 }
 0x5e1   :  { %1406 = vmatpush1.msra.mxu0 %v3169_v8  ;;  %2091 = vmatpush3.msra.mxu1 %v3175_v56 }
 0x5e2   :  { %1407 = vmatprep.subr.mxu0 %v3181_v60  ;;  %2092 = vmatprep.subr.mxu1 %v3628_v9  ;;  %v3694_v60 = vld [vmem:[#allocation28_spill] sm:$0xff] }
 0x5e3   :  { %1408 = vmatpush1.msra.mxu0 %v3188_v33  ;;  %2093 = vmatpush3.msra.mxu1 %v3194_v59  ;;  %v188_v33 = vadd.f32 %v3694_v60, %v2736_v19 }
 0x5e4   :  { %1409 = vmatprep.subr.mxu0 %v3200_v47  ;;  %2094 = vmatprep.subr.mxu1 %v3628_v9 }
 0x5e5   :  { %1410 = vmatpush1.msra.mxu0 %v3207_v63  ;;  %2095 = vmatpush3.msra.mxu1 %v3213_v2 }
 0x5e6   :  { %1411 = vmatprep.subr.mxu0 %v3219_v54  ;;  %2096 = vmatprep.subr.mxu1 %v3628_v9 }
 0x5e7   :  { %1412 = vmatpush1.msra.mxu0 %v3226_v7  ;;  %2097 = vmatpush3.msra.mxu1 %v3232_v0  ;;  %v3496_v0 = vld [vmem:[%s3589_s4] ss:$0 sm:$0xff] }
 0x5e8   :  { %1413 = vmatprep.subr.mxu0 %v3238_v58  ;;  %2098 = vmatprep.subr.mxu1 %v3628_v9 }
 0x5e9   :  { %1414 = vmatpush1.msra.mxu0 %v3245_v6  ;;  %2099 = vmatpush3.msra.mxu1 %v3251_v40  ;;  %v3695_v40 = vld [vmem:[#allocation31_spill] sm:$0xff] }
 0x5ea   :  { %1415 = vmatprep.subr.mxu0 %v3257_v4  ;;  %2100 = vmatprep.subr.mxu1 %v3628_v9  ;;  %v293_v4 = vadd.f32 %v3695_v40, %v2741_v62 }
 0x5eb   :  { %1416 = vmatpush1.msra.mxu0 %v3264_v1  ;;  %2101 = vmatpush3.msra.mxu1 %v3270_v10 }
 0x5ec   :  { %1417 = vmatprep.subr.mxu0 %v3276_v11  ;;  %2102 = vmatprep.subr.mxu1 %v3628_v9 }
 0x5ed   :  { %1418 = vmatpush1.msra.mxu0 %v3283_v12  ;;  %2103 = vmatpush3.msra.mxu1 %v3289_v13 }
 0x5ee   :  { %1419 = vmatprep.subr.mxu0 %v3295_v14  ;;  %2104 = vmatprep.subr.mxu1 %v3628_v9 }
 0x5ef   :  { %1420 = vmatpush1.msra.mxu0 %v3302_v17  ;;  %2105 = vmatpush3.msra.mxu1 %v3308_v18 }
 0x5f0   :  { %1421 = vmatprep.subr.mxu0 %v3314_v20  ;;  %2106 = vmatprep.subr.mxu1 %v3628_v9  ;;  %v1584_v20 = vld [vmem:[%s3590_s5 + $0x78] sm:$0xff] }
 0x5f1   :  { %1422 = vmatpush1.msra.mxu0 %v3321_v21  ;;  %2107 = vmatpush3.msra.mxu1 %v3327_v22  ;;  %v1583_v21 = vld [vmem:[%s3590_s5 + $0x70] sm:$0xff]  ;;  %v1582_v22 = vld [vmem:[%s3590_s5 + $0x68] sm:$0xff] }
 0x5f2   :  { %1423 = vmatprep.subr.mxu0 %v3333_v23  ;;  %2108 = vmatprep.subr.mxu1 %v3628_v9  ;;  %v1581_v23 = vld [vmem:[%s3590_s5 + $0x60] sm:$0xff] }
 0x5f3   :  { %1424 = vmatpush1.msra.mxu0 %v3340_v24  ;;  %2109 = vmatpush3.msra.mxu1 %v3346_v25  ;;  %v1580_v24 = vld [vmem:[%s3590_s5 + $0x58] sm:$0xff]  ;;  %v1579_v25 = vld [vmem:[%s3590_s5 + $0x50] sm:$0xff] }
 0x5f4   :  { %1425 = vmatprep.subr.mxu0 %v3352_v27  ;;  %2110 = vmatprep.subr.mxu1 %v3628_v9  ;;  %v1578_v27 = vld [vmem:[%s3590_s5 + $0x48] sm:$0xff] }
 0x5f5   :  { %1426 = vmatpush1.msra.mxu0 %v3359_v28  ;;  %2111 = vmatpush3.msra.mxu1 %v3365_v29  ;;  %v1577_v28 = vld [vmem:[%s3590_s5 + $0x40] sm:$0xff]  ;;  %v1576_v29 = vld [vmem:[%s3590_s5 + $0x38] sm:$0xff] }
 0x5f6   :  { %1427 = vmatprep.subr.mxu0 %v3371_v30  ;;  %2112 = vmatprep.subr.mxu1 %v3628_v9  ;;  %v1575_v30 = vld [vmem:[%s3590_s5 + $0x30] sm:$0xff] }
 0x5f7   :  { %1428 = vmatpush1.msra.mxu0 %v3687_v5  ;;  %2113 = vmatpush3.msra.mxu1 %v3688_v16 }
 0x5f8   :  { %1429 = vmatprep.subr.mxu0 %v3689_v49  ;;  %2114 = vmatprep.subr.mxu1 %v3628_v9 }
 0x5f9   :  { %1430 = vmatpush1.msra.mxu0 %v3690_v50  ;;  %1463 = vmatprep.mubr.f32.mxu0 %v3628_v9 }
 0x5fa   :  { %2115 = vmatpush3.msra.mxu1 %v3691_v51  ;;  %2116 = vmatprep.mubr.msk.f32.mxu1 %vm2313_vm1, %v3628_v9 }
 0x5fb   :  { %2119 = vmatprep.subr.mxu0 %v3628_v9 }
 0x69a   :  { %v1299_v57 = vpop.f32.mrf.mxu0  ;;  %v1370_v61 = vpop.f32.mrf.mxu1 }
 0x69b   :  { %v1374_v26 = vadd.f32 %v1299_v57, %v186_v55  ;;  %v1388_v58 = vadd.f32 %v3496_v0, %v1370_v61  ;;  %v3698_v55 = vld [vmem:[#allocation29_spill] sm:$0xff] }
 0x69c   :  { %v2083_v3 = vpop.f32.mrf.mxu1  ;;  %v1301_v56 = vpop.f32.mrf.mxu0  ;;  %v298_v57 = vadd.f32 %v3698_v55, %v2741_v62  ;;  %v1711_v62 = vld [vmem:[%s3591_s6] ss:$0 sm:$0xff] }
 0x69d   :  { %v1706_v8 = vmul.f32 -1.442695, %v1374_v26  ;;  %v1375_v59 = vadd.f32 %v1301_v56, %v188_v33 }
 0x69f   :  { %2217 = vpow2.f32 %v1706_v8  ;;  %v1707_v47 = vmul.f32 -1.442695, %v1375_v59 }
 0x6a1   :  { %2219 = vpow2.f32 %v1707_v47 }
 0x6ac   :  { %v2218_v63 = vpop.eup %2217 }
 0x6ad   :  { %v1382_v2 = vadd.f32 1.0, %v2218_v63 }
 0x6ae   :  { %v2220_v54 = vpop.eup %2219 }
 0x6af   :  { %2221 = vrcp.f32 %v1382_v2  ;;  %v1383_v7 = vadd.f32 1.0, %v2220_v54 }
 0x6b1   :  { %2223 = vrcp.f32 %v1383_v7 }
 0x6bc   :  { %v2222_v6 = vpop.eup %2221 }
 0x6bd   :  { %v1389_v1 = vmul.f32 %v2222_v6, %v1388_v58 }
 0x6be   :  { %v2224_v11 = vpop.eup %2223 }
 0x6bf   :  { %v1390_v10 = vadd.f32 %v1389_v1, %v293_v4  ;;  %v1392_v12 = vsub.f32 1.0, %v2224_v11  ;;  %v1394_v17 = vmul.f32 %v2224_v11, %v3419_v34  ;;  %v194_v34 = vadd.f32 %v3697_v35, %v2736_v19 }
 0x6c1   :  { %2225 = vtanh.f32 %v1390_v10 }
 0x6ce   :  { %v2226_v13 = vpop.eup %2225 }
 0x6cf   :  { %v1393_v14 = vmul.f32 %v2226_v13, %v1392_v12 }
 0x6d1   :  { %v3502_v18 = vadd.f32 %v1394_v17, %v1393_v14 }
 0x6d3   :  { %1464 = vmatmul.mubr.f32.vlgmr.msra.gmra.mxu0 %v3502_v18  ;;  %2117 = vmatmul.mubr.f32.vlgmr.msra.gmra.mxu1 %v3502_v18 }
 0x6d4   :  { %2151 = vmatprep.mubr.msk.f32.mxu0 %vm2313_vm1, %v3628_v9  ;;  %2120 = vmatpush3.msra.mxu0 %v1584_v20 }
 0x6d5   :  { %2121 = vmatprep.subr.mxu0 %v3628_v9 }
 0x6d6   :  { %2122 = vmatpush3.msra.mxu0 %v1583_v21 }
 0x6d7   :  { %2123 = vmatprep.subr.mxu0 %v3628_v9 }
 0x6d8   :  { %2124 = vmatpush3.msra.mxu0 %v1582_v22 }
 0x6d9   :  { %2125 = vmatprep.subr.mxu0 %v3628_v9 }
 0x6da   :  { %2126 = vmatpush3.msra.mxu0 %v1581_v23 }
 0x6db   :  { %2127 = vmatprep.subr.mxu0 %v3628_v9 }
 0x6dc   :  { %2128 = vmatpush3.msra.mxu0 %v1580_v24 }
 0x6dd   :  { %2129 = vmatprep.subr.mxu0 %v3628_v9 }
 0x6de   :  { %2130 = vmatpush3.msra.mxu0 %v1579_v25 }
 0x6df   :  { %2131 = vmatprep.subr.mxu0 %v3628_v9 }
 0x6e0   :  { %2132 = vmatpush3.msra.mxu0 %v1578_v27 }
 0x6e1   :  { %2133 = vmatprep.subr.mxu0 %v3628_v9 }
 0x6e2   :  { %2134 = vmatpush3.msra.mxu0 %v1577_v28 }
 0x6e3   :  { %2135 = vmatprep.subr.mxu0 %v3628_v9 }
 0x6e4   :  { %2136 = vmatpush3.msra.mxu0 %v1576_v29 }
 0x6e5   :  { %2137 = vmatprep.subr.mxu0 %v3628_v9 }
 0x6e6   :  { %2138 = vmatpush3.msra.mxu0 %v1575_v30 }
 0x6e7   :  { %2139 = vmatprep.subr.mxu0 %v3628_v9 }
 0x6e8   :  { %2140 = vmatpush3.msra.mxu0 %v1574_v31 }
 0x6e9   :  { %2141 = vmatprep.subr.mxu0 %v3628_v9 }
 0x6ea   :  { %2142 = vmatpush3.msra.mxu0 %v1573_v32 }
 0x6eb   :  { %2143 = vmatprep.subr.mxu0 %v3628_v9 }
 0x6ec   :  { %2144 = vmatpush3.msra.mxu0 %v1572_v41 }
 0x6ed   :  { %2145 = vmatprep.subr.mxu0 %v3628_v9 }
 0x6ee   :  { %2146 = vmatpush3.msra.mxu0 %v1571_v48 }
 0x6ef   :  { %2147 = vmatprep.subr.mxu0 %v3628_v9 }
 0x6f0   :  { %2148 = vmatpush3.msra.mxu0 %v1570_v15 }
 0x6f1   :  { %2149 = vmatprep.subr.mxu0 %v3628_v9 }
 0x6f2   :  { %2150 = vmatpush3.msra.mxu0 %v1569_v37 }
 0x793   :  { %v1465_v42 = vpop.f32.mrf.mxu0  ;;  %v1536_v43 = vpop.f32.mrf.mxu1 }
 0x794   :  { %v1540_v46 = vadd.f32 %v1465_v42, %v192_v39  ;;  %v1554_v52 = vadd.f32 %v3496_v0, %v1536_v43 }
 0x795   :  { %v2118_v44 = vpop.f32.mrf.mxu1  ;;  %v1467_v36 = vpop.f32.mrf.mxu0 }
 0x796   :  { %v1708_v45 = vmul.f32 -1.442695, %v1540_v46  ;;  %v1541_v5 = vadd.f32 %v1467_v36, %v194_v34 }
 0x798   :  { %2227 = vpow2.f32 %v1708_v45  ;;  %v1709_v16 = vmul.f32 -1.442695, %v1541_v5 }
 0x79a   :  { %2229 = vpow2.f32 %v1709_v16 }
 0x7a5   :  { %v2228_v49 = vpop.eup %2227 }
 0x7a6   :  { %v1548_v50 = vadd.f32 1.0, %v2228_v49 }
 0x7a7   :  { %v2230_v9 = vpop.eup %2229 }
 0x7a8   :  { %2231 = vrcp.f32 %v1548_v50  ;;  %v1549_v51 = vadd.f32 1.0, %v2230_v9 }
 0x7aa   :  { %2233 = vrcp.f32 %v1549_v51 }
 0x7b5   :  { %v2232_v53 = vpop.eup %2231 }
 0x7b6   :  { %v1555_v61 = vmul.f32 %v2232_v53, %v1554_v52 }
 0x7b7   :  { %v2234_v19 = vpop.eup %2233 }
 0x7b8   :  { %v1556_v26 = vadd.f32 %v1555_v61, %v298_v57  ;;  %v1558_v3 = vsub.f32 1.0, %v2234_v19  ;;  %v1560_v60 = vmul.f32 %v2234_v19, %v3502_v18 }
 0x7ba   :  { %2235 = vtanh.f32 %v1556_v26 }
 0x7c7   :  { %v2236_v8 = vpop.eup %2235 }
 0x7c8   :  { %v1559_v56 = vmul.f32 %v2236_v8, %v1558_v3 }
 0x7ca   :  { %v1561_v33 = vadd.f32 %v1560_v60, %v1559_v56 }
 0x7cc   :  { %v1710_v59 = vmul.f32 -1.442695, %v1561_v33 }
 0x7ce   :  { %2237 = vpow2.f32 %v1710_v59 }
 0x7db   :  { %v2238_v47 = vpop.eup %2237 }
 0x7dc   :  { %v1565_v63 = vadd.f32 1.0, %v2238_v47 }
 0x7de   :  { %2239 = vrcp.f32 %v1565_v63 }
 0x7eb   :  { %v2240_v2 = vpop.eup %2239 }
 0x7ec   :  { %v1568_v54 = vmul.f32 %v2240_v2, %v1561_v33 }
 0x7ee   :  { %2152 = vmatmul.mubr.f32.vlgmr.msra.gmra.mxu0 %v1568_v54 }
 0x8ae   :  { %v1658_v7 = vpop.f32.mrf.mxu0 }
 0x8af   :  { %v1659_v0 = vadd.f32 %v1711_v62, %v1658_v7 }
 0x8b0   :  { %v2153_v58 = vpop.f32.mrf.mxu0 }
 0x8b1   :  { %1662 = vst [vmem:[#allocation3] sm:$0xff] %v1659_v0 }
 0x8b2   :  { %2301 = shalt.err (!%p2298_p4)
}
 0x8b3   :  { %1672 = dma.vmem_to_hbm [thread:$0]  %s1670_s3, 128, %s3592_s7, [#allocation4]  }
 0x8b4   :  { %2310 = dma.done.wait [#allocation4], 128  }
 0x8b5   :  { %2311 = vsyncadd [#allocation4], 4294967168 }
 0x8b6   :  { %1676 = vsyncpa [#allocation4], 1 }

</bundles_post_ra>
